<compile_context>
chip_gen: v6e
topology: v6e:2x2x1
jax: 0.10.0
libtpu: 0.0.40
codegen_flags: <defaults>
</compile_context>

<pallas_src>
import jax
import jax.numpy as jnp
from jax import lax
from jax.experimental import pallas as pl
from jax.experimental.pallas import tpu as pltpu

B, C, H, W = 2, 4, 16, 16
K = 7
PAD = 3
HID = 4 * C
WC = W * C                     # 64
LANES = B * WC                 # 128 : lane = b*W*C + w*C + c
HLANES = B * W * HID           # 512 : lane = b*W*HID + w*HID + j
VEC = LANES + HLANES + LANES   # 768 : packed [dw_bias | b1' | b2] row
EPS = 1e-6
INV_SQRT2 = 0.7071067811865476


def convnext_block_kernel(x_ref, mats_ref, w1_ref, w2_ref, vec_ref, o_ref, pad_ref):
    # x_ref    : (H, 128)       lane-dense input slab, both images packed on lanes
    # mats_ref : (8, 128, 128)  [0:7] banded depthwise-conv matrices A_dy,
    #                           [7]   block-diag per-pixel channel-mean matrix
    # w1_ref   : (128, 512)     block-diag Linear(C,4C) weight, LN affine folded in
    # w2_ref   : (512, 128)     block-diag Linear(4C,C) weight
    # vec_ref  : (1, 768)       [dw_bias | b1' | b2] tiled over the (b, w) pixels
    # pad_ref  : (H+6, 128)     VMEM halo scratch (row padding for the "same" conv)
    x = x_ref[...]

    # Build the H-padded slab: zero only the two 3-row halo strips, copy interior
    # at lane offset 0 (single step, so this runs exactly once).
    pad_ref[0:PAD, :] = jnp.zeros((PAD, LANES), jnp.float32)
    pad_ref[PAD + H:2 * PAD + H, :] = jnp.zeros((PAD, LANES), jnp.float32)
    pad_ref[PAD:PAD + H, :] = x

    # Depthwise 7x7 conv on the MXU: 7 accumulated matmuls against banded
    # matrices folding the dx shift, per-channel tap and W zero-padding.
    acc = jnp.zeros((H, LANES), jnp.float32) + vec_ref[:, 0:LANES]      # + dw bias
    for dy in range(K):
        acc = acc + jnp.dot(pad_ref[dy:dy + H, :], mats_ref[dy],
                            preferred_element_type=jnp.float32)

    # LayerNorm over channels: mean / var as matmuls on the MXU.
    # (gamma, beta) are folded into w1 / b1' in the wrapper.
    mean = jnp.dot(acc, mats_ref[K], preferred_element_type=jnp.float32)
    yc = acc - mean
    var = jnp.dot(yc * yc, mats_ref[K], preferred_element_type=jnp.float32)
    y = yc * lax.rsqrt(var + EPS)

    # Pointwise MLP via block-diagonal weights (stays lane-dense throughout).
    h = jnp.dot(y, w1_ref[...], preferred_element_type=jnp.float32) \
        + vec_ref[:, LANES:LANES + HLANES]
    h = 0.5 * h * (1.0 + lax.erf(h * INV_SQRT2))                        # exact GELU
    z = jnp.dot(h, w2_ref[...], preferred_element_type=jnp.float32) \
        + vec_ref[:, LANES + HLANES:VEC]

    # Residual.
    o_ref[...] = (x + z).astype(o_ref.dtype)


@jax.jit
def convnext_block(x_nchw, params):
    dw_w, dw_b, ln_g, ln_b, w1, b1, w2, b2 = params
    f32 = jnp.float32

    # NCHW -> (H, B*W*C): lane = b*W*C + w*C + c  (128-lane slab).
    x2 = jnp.transpose(x_nchw, (2, 0, 3, 1)).reshape(H, LANES).astype(f32)

    # Banded conv matrices: A[dy, w_in*C+c, w_out*C+c] = dw_w[c, dy, w_in-w_out+3],
    # zero outside the valid band (this realises the W-direction "same" padding).
    wi = jnp.arange(W)
    dx = wi[:, None] - wi[None, :] + PAD                           # (W_in, W_out)
    valid = ((dx >= 0) & (dx < K)).astype(f32)
    taps = dw_w.astype(f32)[:, :, jnp.clip(dx, 0, K - 1)]          # (C, K, W, W)
    taps = taps * valid[None, None]
    a_one = jnp.einsum('cyij,cd->yicjd', taps,
                       jnp.eye(C, dtype=f32)).reshape(K, WC, WC)   # (7, 64, 64)
    a_full = jnp.einsum('yij,bd->ybidj', a_one,
                        jnp.eye(B, dtype=f32)).reshape(K, LANES, LANES)

    # Per-pixel channel-mean matrix (block-diagonal over the B*W pixels).
    mmean = jnp.kron(jnp.eye(B * W, dtype=f32), jnp.ones((C, C), f32) / C)
    mats = jnp.concatenate([a_full, mmean[None]], axis=0)          # (8, 128, 128)

    # Fold the LayerNorm affine into the first pointwise conv (exact).
    w1p = ln_g.astype(f32)[:, None] * w1.astype(f32)               # (C, HID)
    b1p = b1.astype(f32) + ln_b.astype(f32) @ w1.astype(f32)       # (HID,)

    w1_big = jnp.kron(jnp.eye(B * W, dtype=f32), w1p)              # (128, 512)
    w2_big = jnp.kron(jnp.eye(B * W, dtype=f32), w2.astype(f32))   # (512, 128)

    # All bias-like rows packed into a single (1, 768) operand.
    vecs = jnp.concatenate([jnp.tile(dw_b.astype(f32), B * W),
                            jnp.tile(b1p, B * W),
                            jnp.tile(b2.astype(f32), B * W)]).reshape(1, VEC)

    out2 = pl.pallas_call(
        convnext_block_kernel,
        out_shape=jax.ShapeDtypeStruct((H, LANES), x_nchw.dtype),
        grid_spec=pltpu.PrefetchScalarGridSpec(
            num_scalar_prefetch=0,
            grid=(1,),   # single step: both images processed in one invocation
            in_specs=[
                pl.BlockSpec((H, LANES), lambda i: (0, 0)),
                pl.BlockSpec((K + 1, LANES, LANES), lambda i: (0, 0, 0)),
                pl.BlockSpec((LANES, HLANES), lambda i: (0, 0)),
                pl.BlockSpec((HLANES, LANES), lambda i: (0, 0)),
                pl.BlockSpec((1, VEC), lambda i: (0, 0)),
            ],
            out_specs=pl.BlockSpec((H, LANES), lambda i: (0, 0)),
            scratch_shapes=[pltpu.VMEM((H + 2 * PAD, LANES), jnp.float32)],
        ),
        compiler_params=pltpu.CompilerParams(dimension_semantics=("arbitrary",)),
    )(x2, mats, w1_big, w2_big, vecs)

    # (H, B*W*C) -> NCHW.
    return jnp.transpose(out2.reshape(H, B, W, C), (1, 3, 0, 2))


def reference(x_nchw, params):
    dw_w, dw_b, ln_g, ln_b, w1, b1, w2, b2 = params
    dw = lax.conv_general_dilated(
        x_nchw, dw_w.reshape(C, 1, K, K), window_strides=(1, 1),
        padding=((PAD, PAD), (PAD, PAD)),
        dimension_numbers=("NCHW", "OIHW", "NCHW"),
        feature_group_count=C) + dw_b[None, :, None, None]
    y = jnp.transpose(dw, (0, 2, 3, 1))
    mean = y.mean(-1, keepdims=True)
    var = ((y - mean) ** 2).mean(-1, keepdims=True)
    y = (y - mean) / jnp.sqrt(var + EPS) * ln_g + ln_b
    h = y @ w1 + b1
    h = jax.nn.gelu(h, approximate=False)
    y = h @ w2 + b2
    return x_nchw + jnp.transpose(y, (0, 3, 1, 2))


if __name__ == "__main__":
    key = jax.random.PRNGKey(0)
    ks = jax.random.split(key, 9)
    x = jax.random.normal(ks[0], (B, C, H, W), jnp.float32)
    dw_w = jax.random.normal(ks[1], (C, K, K), jnp.float32) * 0.1   # Conv2d (dim,1,7,7) squeezed
    dw_b = jax.random.normal(ks[2], (C,), jnp.float32) * 0.1
    ln_g = 1.0 + jax.random.normal(ks[3], (C,), jnp.float32) * 0.05
    ln_b = jax.random.normal(ks[4], (C,), jnp.float32) * 0.05
    w1 = jax.random.normal(ks[5], (C, HID), jnp.float32) * 0.1      # Linear(dim,4dim).weight.T
    b1 = jax.random.normal(ks[6], (HID,), jnp.float32) * 0.1
    w2 = jax.random.normal(ks[7], (HID, C), jnp.float32) * 0.1      # Linear(4dim,dim).weight.T
    b2 = jax.random.normal(ks[8], (C,), jnp.float32) * 0.1
    params = (dw_w, dw_b, ln_g, ln_b, w1, b1, w2, b2)

    out = jax.block_until_ready(convnext_block(x, params))
    ref = jax.block_until_ready(reference(x, params))
    assert out.shape == (B, C, H, W)
    assert jnp.allclose(out, ref, rtol=1e-4, atol=1e-4), float(jnp.max(jnp.abs(out - ref)))
    print("KERNEL_OK")
</pallas_src>

<mosaic_0001>
module attributes {stable_mosaic.version = 11 : i64} {
  func.func @convnext_block_kernel(%arg0: i32, %arg1: memref<16x128xf32, #tpu.memory_space<vmem>>, %arg2: memref<8x128x128xf32, #tpu.memory_space<vmem>>, %arg3: memref<128x512xf32, #tpu.memory_space<vmem>>, %arg4: memref<512x128xf32, #tpu.memory_space<vmem>>, %arg5: memref<1x768xf32, #tpu.memory_space<vmem>>, %arg6: memref<16x128xf32, #tpu.memory_space<vmem>>, %arg7: memref<22x128xf32, #tpu.memory_space<vmem>>) attributes {dimension_semantics = [#tpu.dimension_semantics<arbitrary>], iteration_bounds = array<i64: 1>, scalar_prefetch = 0 : i64, scratch_operands = 1 : i64, tpu.core_type = #tpu.core_type<tc>, window_params = [{pipeline_mode = #tpu.pipeline_mode<synchronous>, transform_indices = @transform_0, window_bounds = array<i64: 16, 128>}, {pipeline_mode = #tpu.pipeline_mode<synchronous>, transform_indices = @transform_1, window_bounds = array<i64: 8, 128, 128>}, {pipeline_mode = #tpu.pipeline_mode<synchronous>, transform_indices = @transform_2, window_bounds = array<i64: 128, 512>}, {pipeline_mode = #tpu.pipeline_mode<synchronous>, transform_indices = @transform_3, window_bounds = array<i64: 512, 128>}, {pipeline_mode = #tpu.pipeline_mode<synchronous>, transform_indices = @transform_4, window_bounds = array<i64: 1, 768>}, {pipeline_mode = #tpu.pipeline_mode<synchronous>, transform_indices = @transform_5, window_bounds = array<i64: 16, 128>}]} {
    %c0 = arith.constant 0 : index
    %c0_0 = arith.constant 0 : index
    %0 = vector.load %arg1[%c0, %c0_0] : memref<16x128xf32, #tpu.memory_space<vmem>>, vector<16x128xf32>
    %cst = arith.constant 0.000000e+00 : f32
    %1 = vector.broadcast %cst : f32 to vector<3x128xf32>
    %c0_1 = arith.constant 0 : index
    %c0_2 = arith.constant 0 : index
    %2 = vector.load %arg7[%c0_1, %c0_2] : memref<22x128xf32, #tpu.memory_space<vmem>>, vector<3x128xf32>
    tpu.vector_store %arg7[%c0_1, %c0_2], %1 {strides = array<i32>} : memref<22x128xf32, #tpu.memory_space<vmem>>, vector<3x128xf32>,
    %cst_3 = arith.constant 0.000000e+00 : f32
    %3 = vector.broadcast %cst_3 : f32 to vector<3x128xf32>
    %c19 = arith.constant 19 : index
    %c0_4 = arith.constant 0 : index
    %4 = vector.load %arg7[%c19, %c0_4] : memref<22x128xf32, #tpu.memory_space<vmem>>, vector<3x128xf32>
    tpu.vector_store %arg7[%c19, %c0_4], %3 {strides = array<i32>} : memref<22x128xf32, #tpu.memory_space<vmem>>, vector<3x128xf32>,
    %c3 = arith.constant 3 : index
    %c0_5 = arith.constant 0 : index
    %5 = vector.load %arg7[%c3, %c0_5] : memref<22x128xf32, #tpu.memory_space<vmem>>, vector<16x128xf32>
    tpu.vector_store %arg7[%c3, %c0_5], %0 {strides = array<i32>} : memref<22x128xf32, #tpu.memory_space<vmem>>, vector<16x128xf32>,
    %cst_6 = arith.constant 0.000000e+00 : f32
    %6 = vector.broadcast %cst_6 : f32 to vector<16x128xf32>
    %c0_7 = arith.constant 0 : index
    %c0_8 = arith.constant 0 : index
    %7 = vector.load %arg5[%c0_7, %c0_8] : memref<1x768xf32, #tpu.memory_space<vmem>>, vector<1x128xf32>
    %8 = vector.broadcast %7 : vector<1x128xf32> to vector<16x128xf32>
    %9 = arith.addf %6, %8 : vector<16x128xf32>
    %c0_9 = arith.constant 0 : index
    %c0_10 = arith.constant 0 : index
    %10 = vector.load %arg7[%c0_9, %c0_10] : memref<22x128xf32, #tpu.memory_space<vmem>>, vector<16x128xf32>
    %c0_11 = arith.constant 0 : index
    %c0_12 = arith.constant 0 : index
    %c0_13 = arith.constant 0 : index
    %11 = vector.load %arg2[%c0_11, %c0_12, %c0_13] : memref<8x128x128xf32, #tpu.memory_space<vmem>>, vector<1x128x128xf32>
    %12 = vector.shape_cast %11 : vector<1x128x128xf32> to vector<128x128xf32>
    %cst_14 = arith.constant dense<0.000000e+00> : vector<16x128xf32>
    %13 = tpu.matmul %10, %12, %cst_14 {dimension_numbers = #tpu.dot_dimension_numbers<[1], [0], [0], [1], [0, 0, 1, 1], [], []>} : vector<16x128xf32>, vector<128x128xf32>, vector<16x128xf32> -> vector<16x128xf32>
    %14 = arith.addf %9, %13 : vector<16x128xf32>
    %c1 = arith.constant 1 : index
    %c0_15 = arith.constant 0 : index
    %15 = vector.load %arg7[%c1, %c0_15] : memref<22x128xf32, #tpu.memory_space<vmem>>, vector<16x128xf32>
    %c1_16 = arith.constant 1 : index
    %c0_17 = arith.constant 0 : index
    %c0_18 = arith.constant 0 : index
    %16 = vector.load %arg2[%c1_16, %c0_17, %c0_18] : memref<8x128x128xf32, #tpu.memory_space<vmem>>, vector<1x128x128xf32>
    %17 = vector.shape_cast %16 : vector<1x128x128xf32> to vector<128x128xf32>
    %cst_19 = arith.constant dense<0.000000e+00> : vector<16x128xf32>
    %18 = tpu.matmul %15, %17, %cst_19 {dimension_numbers = #tpu.dot_dimension_numbers<[1], [0], [0], [1], [0, 0, 1, 1], [], []>} : vector<16x128xf32>, vector<128x128xf32>, vector<16x128xf32> -> vector<16x128xf32>
    %19 = arith.addf %14, %18 : vector<16x128xf32>
    %c2 = arith.constant 2 : index
    %c0_20 = arith.constant 0 : index
    %20 = vector.load %arg7[%c2, %c0_20] : memref<22x128xf32, #tpu.memory_space<vmem>>, vector<16x128xf32>
    %c2_21 = arith.constant 2 : index
    %c0_22 = arith.constant 0 : index
    %c0_23 = arith.constant 0 : index
    %21 = vector.load %arg2[%c2_21, %c0_22, %c0_23] : memref<8x128x128xf32, #tpu.memory_space<vmem>>, vector<1x128x128xf32>
    %22 = vector.shape_cast %21 : vector<1x128x128xf32> to vector<128x128xf32>
    %cst_24 = arith.constant dense<0.000000e+00> : vector<16x128xf32>
    %23 = tpu.matmul %20, %22, %cst_24 {dimension_numbers = #tpu.dot_dimension_numbers<[1], [0], [0], [1], [0, 0, 1, 1], [], []>} : vector<16x128xf32>, vector<128x128xf32>, vector<16x128xf32> -> vector<16x128xf32>
    %24 = arith.addf %19, %23 : vector<16x128xf32>
    %c3_25 = arith.constant 3 : index
    %c0_26 = arith.constant 0 : index
    %25 = vector.load %arg7[%c3_25, %c0_26] : memref<22x128xf32, #tpu.memory_space<vmem>>, vector<16x128xf32>
    %c3_27 = arith.constant 3 : index
    %c0_28 = arith.constant 0 : index
    %c0_29 = arith.constant 0 : index
    %26 = vector.load %arg2[%c3_27, %c0_28, %c0_29] : memref<8x128x128xf32, #tpu.memory_space<vmem>>, vector<1x128x128xf32>
    %27 = vector.shape_cast %26 : vector<1x128x128xf32> to vector<128x128xf32>
    %cst_30 = arith.constant dense<0.000000e+00> : vector<16x128xf32>
    %28 = tpu.matmul %25, %27, %cst_30 {dimension_numbers = #tpu.dot_dimension_numbers<[1], [0], [0], [1], [0, 0, 1, 1], [], []>} : vector<16x128xf32>, vector<128x128xf32>, vector<16x128xf32> -> vector<16x128xf32>
    %29 = arith.addf %24, %28 : vector<16x128xf32>
    %c4 = arith.constant 4 : index
    %c0_31 = arith.constant 0 : index
    %30 = vector.load %arg7[%c4, %c0_31] : memref<22x128xf32, #tpu.memory_space<vmem>>, vector<16x128xf32>
    %c4_32 = arith.constant 4 : index
    %c0_33 = arith.constant 0 : index
    %c0_34 = arith.constant 0 : index
    %31 = vector.load %arg2[%c4_32, %c0_33, %c0_34] : memref<8x128x128xf32, #tpu.memory_space<vmem>>, vector<1x128x128xf32>
    %32 = vector.shape_cast %31 : vector<1x128x128xf32> to vector<128x128xf32>
    %cst_35 = arith.constant dense<0.000000e+00> : vector<16x128xf32>
    %33 = tpu.matmul %30, %32, %cst_35 {dimension_numbers = #tpu.dot_dimension_numbers<[1], [0], [0], [1], [0, 0, 1, 1], [], []>} : vector<16x128xf32>, vector<128x128xf32>, vector<16x128xf32> -> vector<16x128xf32>
    %34 = arith.addf %29, %33 : vector<16x128xf32>
    %c5 = arith.constant 5 : index
    %c0_36 = arith.constant 0 : index
    %35 = vector.load %arg7[%c5, %c0_36] : memref<22x128xf32, #tpu.memory_space<vmem>>, vector<16x128xf32>
    %c5_37 = arith.constant 5 : index
    %c0_38 = arith.constant 0 : index
    %c0_39 = arith.constant 0 : index
    %36 = vector.load %arg2[%c5_37, %c0_38, %c0_39] : memref<8x128x128xf32, #tpu.memory_space<vmem>>, vector<1x128x128xf32>
    %37 = vector.shape_cast %36 : vector<1x128x128xf32> to vector<128x128xf32>
    %cst_40 = arith.constant dense<0.000000e+00> : vector<16x128xf32>
    %38 = tpu.matmul %35, %37, %cst_40 {dimension_numbers = #tpu.dot_dimension_numbers<[1], [0], [0], [1], [0, 0, 1, 1], [], []>} : vector<16x128xf32>, vector<128x128xf32>, vector<16x128xf32> -> vector<16x128xf32>
    %39 = arith.addf %34, %38 : vector<16x128xf32>
    %c6 = arith.constant 6 : index
    %c0_41 = arith.constant 0 : index
    %40 = vector.load %arg7[%c6, %c0_41] : memref<22x128xf32, #tpu.memory_space<vmem>>, vector<16x128xf32>
    %c6_42 = arith.constant 6 : index
    %c0_43 = arith.constant 0 : index
    %c0_44 = arith.constant 0 : index
    %41 = vector.load %arg2[%c6_42, %c0_43, %c0_44] : memref<8x128x128xf32, #tpu.memory_space<vmem>>, vector<1x128x128xf32>
    %42 = vector.shape_cast %41 : vector<1x128x128xf32> to vector<128x128xf32>
    %cst_45 = arith.constant dense<0.000000e+00> : vector<16x128xf32>
    %43 = tpu.matmul %40, %42, %cst_45 {dimension_numbers = #tpu.dot_dimension_numbers<[1], [0], [0], [1], [0, 0, 1, 1], [], []>} : vector<16x128xf32>, vector<128x128xf32>, vector<16x128xf32> -> vector<16x128xf32>
    %44 = arith.addf %39, %43 : vector<16x128xf32>
    %c7 = arith.constant 7 : index
    %c0_46 = arith.constant 0 : index
    %c0_47 = arith.constant 0 : index
    %45 = vector.load %arg2[%c7, %c0_46, %c0_47] : memref<8x128x128xf32, #tpu.memory_space<vmem>>, vector<1x128x128xf32>
    %46 = vector.shape_cast %45 : vector<1x128x128xf32> to vector<128x128xf32>
    %cst_48 = arith.constant dense<0.000000e+00> : vector<16x128xf32>
    %47 = tpu.matmul %44, %46, %cst_48 {dimension_numbers = #tpu.dot_dimension_numbers<[1], [0], [0], [1], [0, 0, 1, 1], [], []>} : vector<16x128xf32>, vector<128x128xf32>, vector<16x128xf32> -> vector<16x128xf32>
    %48 = arith.subf %44, %47 : vector<16x128xf32>
    %49 = arith.mulf %48, %48 : vector<16x128xf32>
    %c7_49 = arith.constant 7 : index
    %c0_50 = arith.constant 0 : index
    %c0_51 = arith.constant 0 : index
    %50 = vector.load %arg2[%c7_49, %c0_50, %c0_51] : memref<8x128x128xf32, #tpu.memory_space<vmem>>, vector<1x128x128xf32>
    %51 = vector.shape_cast %50 : vector<1x128x128xf32> to vector<128x128xf32>
    %cst_52 = arith.constant dense<0.000000e+00> : vector<16x128xf32>
    %52 = tpu.matmul %49, %51, %cst_52 {dimension_numbers = #tpu.dot_dimension_numbers<[1], [0], [0], [1], [0, 0, 1, 1], [], []>} : vector<16x128xf32>, vector<128x128xf32>, vector<16x128xf32> -> vector<16x128xf32>
    %cst_53 = arith.constant 9.99999997E-7 : f32
    %53 = vector.broadcast %cst_53 : f32 to vector<16x128xf32>
    %54 = arith.addf %52, %53 : vector<16x128xf32>
    %55 = math.rsqrt %54 : vector<16x128xf32>
    %56 = arith.mulf %48, %55 : vector<16x128xf32>
    %c0_54 = arith.constant 0 : index
    %c0_55 = arith.constant 0 : index
    %57 = vector.load %arg3[%c0_54, %c0_55] : memref<128x512xf32, #tpu.memory_space<vmem>>, vector<128x512xf32>
    %cst_56 = arith.constant dense<0.000000e+00> : vector<16x512xf32>
    %58 = tpu.matmul %56, %57, %cst_56 {dimension_numbers = #tpu.dot_dimension_numbers<[1], [0], [0], [1], [0, 0, 1, 1], [], []>} : vector<16x128xf32>, vector<128x512xf32>, vector<16x512xf32> -> vector<16x512xf32>
    %c0_57 = arith.constant 0 : index
    %c128 = arith.constant 128 : index
    %59 = vector.load %arg5[%c0_57, %c128] : memref<1x768xf32, #tpu.memory_space<vmem>>, vector<1x512xf32>
    %60 = vector.broadcast %59 : vector<1x512xf32> to vector<16x512xf32>
    %61 = arith.addf %58, %60 : vector<16x512xf32>
    %cst_58 = arith.constant 5.000000e-01 : f32
    %62 = vector.broadcast %cst_58 : f32 to vector<16x512xf32>
    %63 = arith.mulf %62, %61 : vector<16x512xf32>
    %cst_59 = arith.constant 0.707106769 : f32
    %64 = vector.broadcast %cst_59 : f32 to vector<16x512xf32>
    %65 = arith.mulf %61, %64 : vector<16x512xf32>
    %66 = math.erf %65 : vector<16x512xf32>
    %cst_60 = arith.constant 1.000000e+00 : f32
    %67 = vector.broadcast %cst_60 : f32 to vector<16x512xf32>
    %68 = arith.addf %67, %66 : vector<16x512xf32>
    %69 = arith.mulf %63, %68 : vector<16x512xf32>
    %c0_61 = arith.constant 0 : index
    %c0_62 = arith.constant 0 : index
    %70 = vector.load %arg4[%c0_61, %c0_62] : memref<512x128xf32, #tpu.memory_space<vmem>>, vector<512x128xf32>
    %cst_63 = arith.constant dense<0.000000e+00> : vector<16x128xf32>
    %71 = tpu.matmul %69, %70, %cst_63 {dimension_numbers = #tpu.dot_dimension_numbers<[1], [0], [0], [1], [0, 0, 1, 1], [], []>} : vector<16x512xf32>, vector<512x128xf32>, vector<16x128xf32> -> vector<16x128xf32>
    %c0_64 = arith.constant 0 : index
    %c640 = arith.constant 640 : index
    %72 = vector.load %arg5[%c0_64, %c640] : memref<1x768xf32, #tpu.memory_space<vmem>>, vector<1x128xf32>
    %73 = vector.broadcast %72 : vector<1x128xf32> to vector<16x128xf32>
    %74 = arith.addf %71, %73 : vector<16x128xf32>
    %75 = arith.addf %0, %74 : vector<16x128xf32>
    %c0_65 = arith.constant 0 : index
    %c0_66 = arith.constant 0 : index
    %76 = vector.load %arg6[%c0_65, %c0_66] : memref<16x128xf32, #tpu.memory_space<vmem>>, vector<16x128xf32>
    tpu.vector_store %arg6[%c0_65, %c0_66], %75 {strides = array<i32>} : memref<16x128xf32, #tpu.memory_space<vmem>>, vector<16x128xf32>,
    return
  }
  func.func @transform_0(%arg0: i32) -> (i32, i32) {
    %c0_i32 = arith.constant 0 : i32
    %c0_i32_0 = arith.constant 0 : i32
    %c0_i32_1 = arith.constant 0 : i32
    return %c0_i32, %c0_i32_0 : i32, i32
  }
  func.func @transform_1(%arg0: i32) -> (i32, i32, i32) {
    %c0_i32 = arith.constant 0 : i32
    %c0_i32_0 = arith.constant 0 : i32
    %c0_i32_1 = arith.constant 0 : i32
    %c0_i32_2 = arith.constant 0 : i32
    return %c0_i32, %c0_i32_0, %c0_i32_1 : i32, i32, i32
  }
  func.func @transform_2(%arg0: i32) -> (i32, i32) {
    %c0_i32 = arith.constant 0 : i32
    %c0_i32_0 = arith.constant 0 : i32
    %c0_i32_1 = arith.constant 0 : i32
    return %c0_i32, %c0_i32_0 : i32, i32
  }
  func.func @transform_3(%arg0: i32) -> (i32, i32) {
    %c0_i32 = arith.constant 0 : i32
    %c0_i32_0 = arith.constant 0 : i32
    %c0_i32_1 = arith.constant 0 : i32
    return %c0_i32, %c0_i32_0 : i32, i32
  }
  func.func @transform_4(%arg0: i32) -> (i32, i32) {
    %c0_i32 = arith.constant 0 : i32
    %c0_i32_0 = arith.constant 0 : i32
    %c0_i32_1 = arith.constant 0 : i32
    return %c0_i32, %c0_i32_0 : i32, i32
  }
  func.func @transform_5(%arg0: i32) -> (i32, i32) {
    %c0_i32 = arith.constant 0 : i32
    %c0_i32_0 = arith.constant 0 : i32
    %c0_i32_1 = arith.constant 0 : i32
    return %c0_i32, %c0_i32_0 : i32, i32
  }
}

</mosaic_0001>

<bundles_post_ra>
// kernel: tile.28
= control target key start
LH: loop header
LB: loop body
LE: loop exit
PB: predicated region body
PF: predicated region fallthrough
CT: control target
= control target key end

     0   :  { %s40_s0 = inlined_call_operand.vmem [shape: f32[4], index: 0, kind: input, shape index: {}]   ;;  %s41_s1 = inlined_call_operand.vmem [shape: f32[32,4], index: 1, kind: output, shape index: {}]  }
   0x1   :  { %v4_v0 = vld [vmem:[%s40_s0] ss:$0 sm:$0xff] }
   0x2   :  { %5 = vst [vmem:[%s41_s1] sm:$0xff] %v4_v0  ;;  %12 = vst [vmem:[%s41_s1 + $0x8] sm:$0xff] %v4_v0 }
   0x3   :  { %13 = vst [vmem:[%s41_s1 + $0x10] sm:$0xff] %v4_v0  ;;  %14 = vst [vmem:[%s41_s1 + $0x18] sm:$0xff] %v4_v0 }

// kernel: tile.29
= control target key start
LH: loop header
LB: loop body
LE: loop exit
PB: predicated region body
PF: predicated region fallthrough
CT: control target
= control target key end

     0   :  { %s261_s10 = smov 124   ;;  %s262_s11 = smov 116   ;;  %vm3_vm0 = vcmask 31744   ;;  %vm9_vm1 = vcmask 1048544   ;;  %vm15_vm2 = vcmask 1015744   ;;  %vm21_vm3 = vcmask 982944   ;;  %s401_s0 = inlined_call_operand.vmem [shape: f32[32,4], index: 0, kind: input, shape index: {}]   ;;  %s402_s1 = inlined_call_operand.vmem [shape: f32[128], index: 1, kind: output, shape index: {}]  }
   0x1   :  { %v199_v0 = vld [vmem:[%s401_s0 + $0x1f] sm:$0x1]   ;;  %v201_v1 = vld [vmem:[%s401_s0 + $0x1d] sm:$0x1]   ;;  %v200_v2 = vld [vmem:[%s401_s0 + $0x1e] sm:$0x1]  }
   0x2   :  { %7 = vrot.lane.b32.xlu0 %v199_v0, %s261_s10  ;;  %19 = vrot.lane.b32.xlu1 %v201_v1, %s262_s11  ;;  %v202_v3 = vld [vmem:[%s401_s0 + $0x1c] sm:$0x1]   ;;  %s263_s16 = smov 120   ;;  %s264_s17 = smov 112   ;;  %v203_v4 = vld [vmem:[%s401_s0 + $0x1b] sm:$0x1]  }
   0x3   :  { %v204_v5 = vld [vmem:[%s401_s0 + $0x1a] sm:$0x1]   ;;  %s265_s22 = smov 108   ;;  %s266_s23 = smov 104   ;;  %v205_v6 = vld [vmem:[%s401_s0 + $0x19] sm:$0x1]  }
   0x4   :  { %v206_v7 = vld [vmem:[%s401_s0 + $0x18] sm:$0x1]   ;;  %s267_s28 = smov 100   ;;  %s268_s29 = smov 96   ;;  %v207_v8 = vld [vmem:[%s401_s0 + $0x17] sm:$0x1]  }
   0x5   :  { %v208_v9 = vld [vmem:[%s401_s0 + $0x16] sm:$0x1]   ;;  %v2_v10 = vld [vmem:[%s401_s0] sm:$0x1]   ;;  %s269_s7 = smov 92   ;;  %s270_s8 = smov 88  }
   0x6   :  { %13 = vrot.lane.b32.xlu0 %v200_v2, %s263_s16  ;;  %25 = vrot.lane.b32.xlu1 %v202_v3, %s264_s17  ;;  %4 = vst.msk [vmem:[#allocation0] sm:$0x1] %vm3_vm0, %v2_v10   ;;  %v209_v11 = vld [vmem:[%s401_s0 + $0x15] sm:$0x1]   ;;  %v210_v12 = vld [vmem:[%s401_s0 + $0x14] sm:$0x1]  }
   0x7   :  { %s271_s13 = smov 84   ;;  %s272_s14 = smov 80   ;;  %v211_v13 = vld [vmem:[%s401_s0 + $0x13] sm:$0x1]   ;;  %v212_v14 = vld [vmem:[%s401_s0 + $0x12] sm:$0x1]  }
   0x8   :  { %s273_s19 = smov 76   ;;  %s274_s20 = smov 72   ;;  %v213_v15 = vld [vmem:[%s401_s0 + $0x11] sm:$0x1]   ;;  %v214_v16 = vld [vmem:[%s401_s0 + $0x10] sm:$0x1]  }
   0x9   :  { %s275_s25 = smov 68   ;;  %s276_s26 = smov 64   ;;  %v215_v17 = vld [vmem:[%s401_s0 + $0xf] sm:$0x1]   ;;  %v216_v18 = vld [vmem:[%s401_s0 + $0xe] sm:$0x1]  }
   0xa   :  { %31 = vrot.lane.b32.xlu0 %v203_v4, %s265_s22  ;;  %37 = vrot.lane.b32.xlu1 %v204_v5, %s266_s23  ;;  %s277_s2 = smov 60   ;;  %s278_s3 = smov 56   ;;  %v217_v19 = vld [vmem:[%s401_s0 + $0xd] sm:$0x1]   ;;  %v218_v20 = vld [vmem:[%s401_s0 + $0xc] sm:$0x1]  }
   0xb   :  { %s280_s9 = smov 48   ;;  %v219_v21 = vld [vmem:[%s401_s0 + $0xb] sm:$0x1]   ;;  %v220_v22 = vld [vmem:[%s401_s0 + $0xa] sm:$0x1]   ;;  %s282_s15 = smov 40  }
   0xc   :  { %v221_v23 = vld [vmem:[%s401_s0 + $0x9] sm:$0x1]   ;;  %v222_v24 = vld [vmem:[%s401_s0 + $0x8] sm:$0x1]   ;;  %s284_s21 = smov 32   ;;  %s286_s27 = smov 24  }
   0xd   :  { %v223_v25 = vld [vmem:[%s401_s0 + $0x7] sm:$0x1]   ;;  %v224_v26 = vld [vmem:[%s401_s0 + $0x6] sm:$0x1]   ;;  %v225_v27 = vld [vmem:[%s401_s0 + $0x5] sm:$0x1]  }
   0xe   :  { %43 = vrot.lane.b32.xlu0 %v205_v6, %s267_s28  ;;  %49 = vrot.lane.b32.xlu1 %v206_v7, %s268_s29  ;;  %v226_v28 = vld [vmem:[%s401_s0 + $0x4] sm:$0x1]   ;;  %s288_s4 = smov 16   ;;  %v227_v29 = vld [vmem:[%s401_s0 + $0x3] sm:$0x1]   ;;  %s290_s10 = smov 8  }
   0xf   :  { %v228_v30 = vld [vmem:[%s401_s0 + $0x2] sm:$0x1]   ;;  %v229_v31 = vld [vmem:[%s401_s0 + $0x1] sm:$0x1]   ;;  %s291_s0 = smov 4   ;;  %vm27_vm4 = vcmask 950144  }
  0x10   :  { %vm33_vm5 = vcmask 917344   ;;  %vm39_vm6 = vcmask 884544   ;;  %vm45_vm7 = vcmask 851744   ;;  %vm51_vm8 = vcmask 818944  }
  0x11   :  { %vm57_vm9 = vcmask 786144   ;;  %vm63_vm10 = vcmask 753344   ;;  %vm69_vm11 = vcmask 720544   ;;  %vm75_vm12 = vcmask 687744  }
  0x12   :  { %55 = vrot.lane.b32.xlu0 %v207_v8, %s269_s7  ;;  %61 = vrot.lane.b32.xlu1 %v208_v9, %s270_s8  ;;  %s279_s8 = smov 52   ;;  %vm81_vm13 = vcmask 654944   ;;  %vm87_vm14 = vcmask 622144   ;;  %vm93_vm15 = vcmask 589344   ;;  %vm99_vm0 = vcmask 556544  }
  0x16   :  { %67 = vrot.lane.b32.xlu0 %v209_v11, %s271_s13  ;;  %73 = vrot.lane.b32.xlu1 %v210_v12, %s272_s14  ;;  %s281_s14 = smov 44  }
  0x1a   :  { %79 = vrot.lane.b32.xlu0 %v211_v13, %s273_s19  ;;  %85 = vrot.lane.b32.xlu1 %v212_v14, %s274_s20  ;;  %s283_s20 = smov 36  }
  0x1e   :  { %91 = vrot.lane.b32.xlu0 %v213_v15, %s275_s25  ;;  %97 = vrot.lane.b32.xlu1 %v214_v16, %s276_s26  ;;  %s285_s26 = smov 28  }
  0x22   :  { %103 = vrot.lane.b32.xlu0 %v215_v17, %s277_s2  ;;  %109 = vrot.lane.b32.xlu1 %v216_v18, %s278_s3  ;;  %s287_s3 = smov 20  }
  0x26   :  { %115 = vrot.lane.b32.xlu0 %v217_v19, %s279_s8  ;;  %121 = vrot.lane.b32.xlu1 %v218_v20, %s280_s9  ;;  %s289_s9 = smov 12  }
  0x2a   :  { %127 = vrot.lane.b32.xlu0 %v219_v21, %s281_s14  ;;  %133 = vrot.lane.b32.xlu1 %v220_v22, %s282_s15 }
  0x2e   :  { %139 = vrot.lane.b32.xlu0 %v221_v23, %s283_s20  ;;  %145 = vrot.lane.b32.xlu1 %v222_v24, %s284_s21 }
  0x32   :  { %151 = vrot.lane.b32.xlu0 %v223_v25, %s285_s26  ;;  %157 = vrot.lane.b32.xlu1 %v224_v26, %s286_s27 }
  0x36   :  { %163 = vrot.lane.b32.xlu0 %v225_v27, %s287_s3  ;;  %169 = vrot.lane.b32.xlu1 %v226_v28, %s288_s4 }
  0x3a   :  { %175 = vrot.lane.b32.xlu0 %v227_v29, %s289_s9  ;;  %181 = vrot.lane.b32.xlu1 %v228_v30, %s290_s10 }
  0x3e   :  { %187 = vrot.lane.b32.xlu0 %v229_v31, %s291_s0 }
  0x74   :  { %v8_v32 = vpop.permute.xlu0 %7   ;;  %v20_v33 = vpop.permute.xlu1 %19  }
  0x75   :  { %10 = vst.msk [vmem:[#allocation0] sm:$0x1] %vm9_vm1, %v8_v32   ;;  %vm105_vm1 = vcmask 523744  }
  0x78   :  { %v14_v34 = vpop.permute.xlu0 %13   ;;  %v26_v35 = vpop.permute.xlu1 %25  }
  0x79   :  { %16 = vst.msk [vmem:[#allocation0] sm:$0x1] %vm15_vm2, %v14_v34   ;;  %vm111_vm2 = vcmask 490944  }
  0x7a   :  { %22 = vst.msk [vmem:[#allocation0] sm:$0x1] %vm21_vm3, %v20_v33   ;;  %vm117_vm3 = vcmask 458144  }
  0x7b   :  { %28 = vst.msk [vmem:[#allocation0] sm:$0x1] %vm27_vm4, %v26_v35   ;;  %vm123_vm4 = vcmask 425344  }
  0x7c   :  { %v32_v36 = vpop.permute.xlu0 %31   ;;  %v38_v37 = vpop.permute.xlu1 %37  }
  0x7d   :  { %34 = vst.msk [vmem:[#allocation0] sm:$0x1] %vm33_vm5, %v32_v36   ;;  %vm129_vm5 = vcmask 392544  }
  0x7e   :  { %40 = vst.msk [vmem:[#allocation0] sm:$0x1] %vm39_vm6, %v38_v37   ;;  %vm135_vm6 = vcmask 359744  }
  0x80   :  { %v44_v38 = vpop.permute.xlu0 %43   ;;  %v50_v39 = vpop.permute.xlu1 %49  }
  0x81   :  { %46 = vst.msk [vmem:[#allocation0] sm:$0x1] %vm45_vm7, %v44_v38   ;;  %vm141_vm7 = vcmask 326944  }
  0x82   :  { %52 = vst.msk [vmem:[#allocation0] sm:$0x1] %vm51_vm8, %v50_v39   ;;  %vm147_vm8 = vcmask 294144  }
  0x84   :  { %v56_v40 = vpop.permute.xlu0 %55   ;;  %v62_v41 = vpop.permute.xlu1 %61  }
  0x85   :  { %58 = vst.msk [vmem:[#allocation0] sm:$0x1] %vm57_vm9, %v56_v40   ;;  %vm153_vm9 = vcmask 261344  }
  0x86   :  { %64 = vst.msk [vmem:[#allocation0] sm:$0x1] %vm63_vm10, %v62_v41   ;;  %vm159_vm10 = vcmask 228544  }
  0x88   :  { %v68_v42 = vpop.permute.xlu0 %67   ;;  %v74_v43 = vpop.permute.xlu1 %73  }
  0x89   :  { %70 = vst.msk [vmem:[#allocation0] sm:$0x1] %vm69_vm11, %v68_v42   ;;  %vm165_vm11 = vcmask 195744  }
  0x8a   :  { %76 = vst.msk [vmem:[#allocation0] sm:$0x1] %vm75_vm12, %v74_v43   ;;  %vm171_vm12 = vcmask 162944  }
  0x8c   :  { %v80_v44 = vpop.permute.xlu0 %79   ;;  %v86_v45 = vpop.permute.xlu1 %85  }
  0x8d   :  { %82 = vst.msk [vmem:[#allocation0] sm:$0x1] %vm81_vm13, %v80_v44   ;;  %vm177_vm13 = vcmask 130144  }
  0x8e   :  { %88 = vst.msk [vmem:[#allocation0] sm:$0x1] %vm87_vm14, %v86_v45   ;;  %vm183_vm14 = vcmask 97344  }
  0x90   :  { %v92_v46 = vpop.permute.xlu0 %91   ;;  %v98_v47 = vpop.permute.xlu1 %97  }
  0x91   :  { %94 = vst.msk [vmem:[#allocation0] sm:$0x1] %vm93_vm15, %v92_v46   ;;  %vm189_vm15 = vcmask 64544  }
  0x92   :  { %100 = vst.msk [vmem:[#allocation0] sm:$0x1] %vm99_vm0, %v98_v47  }
  0x94   :  { %v104_v48 = vpop.permute.xlu0 %103   ;;  %v110_v49 = vpop.permute.xlu1 %109  }
  0x95   :  { %106 = vst.msk [vmem:[#allocation0] sm:$0x1] %vm105_vm1, %v104_v48  }
  0x96   :  { %112 = vst.msk [vmem:[#allocation0] sm:$0x1] %vm111_vm2, %v110_v49  }
  0x98   :  { %v116_v50 = vpop.permute.xlu0 %115   ;;  %v122_v51 = vpop.permute.xlu1 %121  }
  0x99   :  { %118 = vst.msk [vmem:[#allocation0] sm:$0x1] %vm117_vm3, %v116_v50  }
  0x9a   :  { %124 = vst.msk [vmem:[#allocation0] sm:$0x1] %vm123_vm4, %v122_v51  }
  0x9c   :  { %v128_v52 = vpop.permute.xlu0 %127   ;;  %v134_v53 = vpop.permute.xlu1 %133  }
  0x9d   :  { %130 = vst.msk [vmem:[#allocation0] sm:$0x1] %vm129_vm5, %v128_v52  }
  0x9e   :  { %136 = vst.msk [vmem:[#allocation0] sm:$0x1] %vm135_vm6, %v134_v53  }
  0xa0   :  { %v140_v54 = vpop.permute.xlu0 %139   ;;  %v146_v55 = vpop.permute.xlu1 %145  }
  0xa1   :  { %142 = vst.msk [vmem:[#allocation0] sm:$0x1] %vm141_vm7, %v140_v54  }
  0xa2   :  { %148 = vst.msk [vmem:[#allocation0] sm:$0x1] %vm147_vm8, %v146_v55  }
  0xa4   :  { %v152_v56 = vpop.permute.xlu0 %151   ;;  %v158_v57 = vpop.permute.xlu1 %157  }
  0xa5   :  { %154 = vst.msk [vmem:[#allocation0] sm:$0x1] %vm153_vm9, %v152_v56  }
  0xa6   :  { %160 = vst.msk [vmem:[#allocation0] sm:$0x1] %vm159_vm10, %v158_v57  }
  0xa8   :  { %v164_v58 = vpop.permute.xlu0 %163   ;;  %v170_v59 = vpop.permute.xlu1 %169  }
  0xa9   :  { %166 = vst.msk [vmem:[#allocation0] sm:$0x1] %vm165_vm11, %v164_v58  }
  0xaa   :  { %172 = vst.msk [vmem:[#allocation0] sm:$0x1] %vm171_vm12, %v170_v59  }
  0xac   :  { %v176_v60 = vpop.permute.xlu0 %175   ;;  %v182_v61 = vpop.permute.xlu1 %181  }
  0xad   :  { %178 = vst.msk [vmem:[#allocation0] sm:$0x1] %vm177_vm13, %v176_v60  }
  0xae   :  { %184 = vst.msk [vmem:[#allocation0] sm:$0x1] %vm183_vm14, %v182_v61  }
  0xb0   :  { %v188_v62 = vpop.permute.xlu0 %187  }
  0xb1   :  { %190 = vst.msk [vmem:[#allocation0] sm:$0x1] %vm189_vm15, %v188_v62  }
  0xb8   :  { %v195_v63 = vld [vmem:[#allocation0] sm:$0x1] }
  0xb9   :  { %198 = vst [vmem:[%s402_s1] sm:$0x1] %v195_v63 }

// kernel: tile.23
= control target key start
LH: loop header
LB: loop body
LE: loop exit
PB: predicated region body
PF: predicated region fallthrough
CT: control target
= control target key end

     0   :  { %s40_s0 = inlined_call_operand.vmem [shape: f32[16], index: 0, kind: input, shape index: {}]   ;;  %s41_s1 = inlined_call_operand.vmem [shape: f32[32,16], index: 1, kind: output, shape index: {}]  }
   0x1   :  { %v4_v0 = vld [vmem:[%s40_s0] ss:$0 sm:$0xff] }
   0x2   :  { %5 = vst [vmem:[%s41_s1] sm:$0xff] %v4_v0  ;;  %12 = vst [vmem:[%s41_s1 + $0x8] sm:$0xff] %v4_v0 }
   0x3   :  { %13 = vst [vmem:[%s41_s1 + $0x10] sm:$0xff] %v4_v0  ;;  %14 = vst [vmem:[%s41_s1 + $0x18] sm:$0xff] %v4_v0 }

// kernel: tile.24
= control target key start
LH: loop header
LB: loop body
LE: loop exit
PB: predicated region body
PF: predicated region fallthrough
CT: control target
= control target key end

     0   :  { %s69_s8 = smov 112   ;;  %s70_s11 = smov 80   ;;  %vm3_vm0 = vcmask 130048   ;;  %vm9_vm1 = vcmask 1048448   ;;  %vm15_vm2 = vcmask 917248   ;;  %vm21_vm3 = vcmask 786048   ;;  %s113_s0 = inlined_call_operand.vmem [shape: f32[32,16], index: 0, kind: input, shape index: {}]   ;;  %s114_s1 = inlined_call_operand.vmem [shape: f32[512], index: 1, kind: output, shape index: {}]  }
   0x1   :  { %v55_v0 = vld [vmem:[%s113_s0 + $0x7] ss:$8 sm:$0xf]   ;;  %v57_v1 = vld [vmem:[%s113_s0 + $0x5] ss:$8 sm:$0xf]  }
   0x2   :  { %7 = vrot.lane.b32.xlu0 %v55_v0, %s69_s8  ;;  %19 = vrot.lane.b32.xlu1 %v57_v1, %s70_s11  ;;  %v56_v2 = vld [vmem:[%s113_s0 + $0x6] ss:$8 sm:$0xf]   ;;  %v58_v3 = vld [vmem:[%s113_s0 + $0x4] ss:$8 sm:$0xf]  }
   0x3   :  { %s71_s16 = smov 96   ;;  %v2_v4 = vld [vmem:[%s113_s0] ss:$8 sm:$0xf]   ;;  %s72_s19 = smov 64   ;;  %vm27_vm4 = vcmask 654848  }
   0x4   :  { %v59_v5 = vld [vmem:[%s113_s0 + $0x3] ss:$8 sm:$0xf]   ;;  %4 = vst.msk [vmem:[#allocation0] sm:$0xf] %vm3_vm0, %v2_v4   ;;  %s73_s24 = smov 48  }
   0x5   :  { %v60_v6 = vld [vmem:[%s113_s0 + $0x2] ss:$8 sm:$0xf]   ;;  %s74_s25 = smov 32   ;;  %vm33_vm5 = vcmask 523648   ;;  %vm39_vm6 = vcmask 392448  }
   0x6   :  { %13 = vrot.lane.b32.xlu0 %v56_v2, %s71_s16  ;;  %25 = vrot.lane.b32.xlu1 %v58_v3, %s72_s19  ;;  %v61_v7 = vld [vmem:[%s113_s0 + $0x1] ss:$8 sm:$0xf]   ;;  %s75_s0 = smov 16   ;;  %vm45_vm7 = vcmask 261248  }
   0xa   :  { %31 = vrot.lane.b32.xlu0 %v59_v5, %s73_s24  ;;  %37 = vrot.lane.b32.xlu1 %v60_v6, %s74_s25 }
   0xe   :  { %43 = vrot.lane.b32.xlu0 %v61_v7, %s75_s0 }
  0x74   :  { %v8_v8 = vpop.permute.xlu0 %7   ;;  %v20_v9 = vpop.permute.xlu1 %19  }
  0x75   :  { %10 = vst.msk [vmem:[#allocation0] sm:$0xf] %vm9_vm1, %v8_v8  }
  0x78   :  { %v14_v10 = vpop.permute.xlu0 %13   ;;  %v26_v11 = vpop.permute.xlu1 %25  }
  0x79   :  { %16 = vst.msk [vmem:[#allocation0] sm:$0xf] %vm15_vm2, %v14_v10  }
  0x7a   :  { %22 = vst.msk [vmem:[#allocation0] sm:$0xf] %vm21_vm3, %v20_v9  }
  0x7b   :  { %28 = vst.msk [vmem:[#allocation0] sm:$0xf] %vm27_vm4, %v26_v11  }
  0x7c   :  { %v32_v12 = vpop.permute.xlu0 %31   ;;  %v38_v13 = vpop.permute.xlu1 %37  }
  0x7d   :  { %34 = vst.msk [vmem:[#allocation0] sm:$0xf] %vm33_vm5, %v32_v12  }
  0x7e   :  { %40 = vst.msk [vmem:[#allocation0] sm:$0xf] %vm39_vm6, %v38_v13  }
  0x80   :  { %v44_v14 = vpop.permute.xlu0 %43  }
  0x81   :  { %46 = vst.msk [vmem:[#allocation0] sm:$0xf] %vm45_vm7, %v44_v14  }
  0x88   :  { %v51_v15 = vld [vmem:[#allocation0] sm:$0xf] }
  0x89   :  { %54 = vst [vmem:[%s114_s1] sm:$0xf] %v51_v15 }

// kernel: convnext_block.1
= control target key start
LH: loop header
LB: loop body
LE: loop exit
PB: predicated region body
PF: predicated region fallthrough
CT: control target
= control target key end

     0   :  { %v2111_v3 = vmov 0.0   ;;  %s3087_s1 = inlined_call_operand.vmem [shape: f32[8,128,128], index: 1, kind: input, shape index: {}]   ;;  %s3088_s0 = inlined_call_operand.vmem [shape: f32[16,128], index: 0, kind: input, shape index: {}]   ;;  %s3089_s4 = inlined_call_operand.vmem [shape: f32[1,768], index: 4, kind: input, shape index: {}]   ;;  %s3090_s2 = inlined_call_operand.vmem [shape: f32[128,512], index: 2, kind: input, shape index: {}]   ;;  %s3091_s3 = inlined_call_operand.vmem [shape: f32[512,128], index: 3, kind: input, shape index: {}]   ;;  %s3092_s5 = inlined_call_operand.vmem [shape: f32[16,128], index: 5, kind: output, shape index: {}]  }
   0x1   :  { %v51_v0 = vld [vmem:[%s3087_s1 + $0x78] sm:$0xff]  ;;  %v50_v1 = vld [vmem:[%s3087_s1 + $0x70] sm:$0xff]  ;;  %22 = vst [vmem:[#allocation2] sm:$0x7] %v2111_v3  ;;  %23 = vst [vmem:[#allocation2 + $0x13] sm:$0x7] %v2111_v3 }
   0x2   :  { %v1405_v2 = vld [vmem:[%s3087_s1 + $0xf8] sm:$0xff]  ;;  %1741 = vmatprep.subr.mxu0 %v51_v0  ;;  %v1404_v4 = vld [vmem:[%s3087_s1 + $0xf0] sm:$0xff]  ;;  %v49_v5 = vld [vmem:[%s3087_s1 + $0x68] sm:$0xff] }
   0x3   :  { %1776 = vmatprep.subr.mxu1 %v1405_v2  ;;  %1742 = vmatpush3.msra.mxu0 %v51_v0  ;;  %v1403_v6 = vld [vmem:[%s3087_s1 + $0xe8] sm:$0xff]  ;;  %v48_v7 = vld [vmem:[%s3087_s1 + $0x60] sm:$0xff]  ;;  %v47_v9 = vld [vmem:[%s3087_s1 + $0x58] sm:$0xff] }
   0x4   :  { %1777 = vmatpush3.msra.mxu1 %v1405_v2  ;;  %1743 = vmatprep.subr.mxu0 %v50_v1  ;;  %v1402_v8 = vld [vmem:[%s3087_s1 + $0xe0] sm:$0xff]  ;;  %v1401_v10 = vld [vmem:[%s3087_s1 + $0xd8] sm:$0xff]  ;;  %v46_v11 = vld [vmem:[%s3087_s1 + $0x50] sm:$0xff] }
   0x5   :  { %1778 = vmatprep.subr.mxu1 %v1404_v4  ;;  %1744 = vmatpush3.msra.mxu0 %v50_v1  ;;  %v1400_v12 = vld [vmem:[%s3087_s1 + $0xd0] sm:$0xff]  ;;  %v45_v13 = vld [vmem:[%s3087_s1 + $0x48] sm:$0xff]  ;;  %v2189_v15 = vld [vmem:[%s3088_s0] sm:$0xff] }
   0x6   :  { %1779 = vmatpush3.msra.mxu1 %v1404_v4  ;;  %1745 = vmatprep.subr.mxu0 %v49_v5  ;;  %v1399_v14 = vld [vmem:[%s3087_s1 + $0xc8] sm:$0xff]  ;;  %24 = vst [vmem:[#allocation2 + $0x3] sm:$0xff] %v2189_v15  ;;  %v44_v17 = vld [vmem:[%s3087_s1 + $0x40] sm:$0xff]  ;;  %v43_v19 = vld [vmem:[%s3087_s1 + $0x38] sm:$0xff] }
   0x7   :  { %1780 = vmatprep.subr.mxu1 %v1403_v6  ;;  %1746 = vmatpush3.msra.mxu0 %v49_v5  ;;  %v2194_v16 = vld [vmem:[%s3088_s0 + $0x8] sm:$0xff]  ;;  %v1398_v18 = vld [vmem:[%s3087_s1 + $0xc0] sm:$0xff]  ;;  %v1397_v20 = vld [vmem:[%s3087_s1 + $0xb8] sm:$0xff] }
   0x8   :  { %1781 = vmatpush3.msra.mxu1 %v1403_v6  ;;  %1747 = vmatprep.subr.mxu0 %v48_v7  ;;  %25 = vst [vmem:[#allocation2 + $0xb] sm:$0xff] %v2194_v16  ;;  %v42_v21 = vld [vmem:[%s3087_s1 + $0x30] sm:$0xff]  ;;  %v41_v23 = vld [vmem:[%s3087_s1 + $0x28] sm:$0xff]  ;;  %v40_v25 = vld [vmem:[%s3087_s1 + $0x20] sm:$0xff] }
   0x9   :  { %1782 = vmatprep.subr.mxu1 %v1402_v8  ;;  %1748 = vmatpush3.msra.mxu0 %v48_v7  ;;  %v1396_v22 = vld [vmem:[%s3087_s1 + $0xb0] sm:$0xff]  ;;  %v1395_v24 = vld [vmem:[%s3087_s1 + $0xa8] sm:$0xff]  ;;  %v1394_v26 = vld [vmem:[%s3087_s1 + $0xa0] sm:$0xff] }
   0xa   :  { %1783 = vmatpush3.msra.mxu1 %v1402_v8  ;;  %1749 = vmatprep.subr.mxu0 %v47_v9  ;;  %v39_v27 = vld [vmem:[%s3087_s1 + $0x18] sm:$0xff]  ;;  %v38_v29 = vld [vmem:[%s3087_s1 + $0x10] sm:$0xff]  ;;  %v37_v31 = vld [vmem:[%s3087_s1 + $0x8] sm:$0xff] }
   0xb   :  { %1784 = vmatprep.subr.mxu1 %v1401_v10  ;;  %1750 = vmatpush3.msra.mxu0 %v47_v9  ;;  %v1393_v28 = vld [vmem:[%s3087_s1 + $0x98] sm:$0xff]  ;;  %v1392_v30 = vld [vmem:[%s3087_s1 + $0x90] sm:$0xff]  ;;  %v1391_v32 = vld [vmem:[%s3087_s1 + $0x88] sm:$0xff] }
   0xc   :  { %1785 = vmatpush3.msra.mxu1 %v1401_v10  ;;  %1751 = vmatprep.subr.mxu0 %v46_v11  ;;  %v36_v34 = vld [vmem:[%s3087_s1] sm:$0xff]  ;;  %v1421_v37 = vld [vmem:[%s3087_s1 + $0x178] sm:$0xff]  ;;  %v1420_v40 = vld [vmem:[%s3087_s1 + $0x170] sm:$0xff] }
   0xd   :  { %1786 = vmatprep.subr.mxu1 %v1400_v12  ;;  %1752 = vmatpush3.msra.mxu0 %v46_v11  ;;  %v34_v33 = vld [vmem:[#allocation2] sm:$0xff]  ;;  %v1437_v41 = vld [vmem:[%s3087_s1 + $0x1f8] sm:$0xff]  ;;  %v1419_v42 = vld [vmem:[%s3087_s1 + $0x168] sm:$0xff] }
   0xe   :  { %1787 = vmatpush3.msra.mxu1 %v1400_v12  ;;  %1753 = vmatprep.subr.mxu0 %v45_v13  ;;  %v1390_v35 = vld [vmem:[%s3087_s1 + $0x80] sm:$0xff]  ;;  %v1436_v43 = vld [vmem:[%s3087_s1 + $0x1f0] sm:$0xff]  ;;  %v1435_v45 = vld [vmem:[%s3087_s1 + $0x1e8] sm:$0xff] }
   0xf   :  { %1788 = vmatprep.subr.mxu1 %v1399_v14  ;;  %1754 = vmatpush3.msra.mxu0 %v45_v13  ;;  %v35_v36 = vld [vmem:[#allocation2 + $0x8] sm:$0xff]  ;;  %v1418_v44 = vld [vmem:[%s3087_s1 + $0x160] sm:$0xff]  ;;  %v1417_v46 = vld [vmem:[%s3087_s1 + $0x158] sm:$0xff] }
  0x10   :  { %1789 = vmatpush3.msra.mxu1 %v1399_v14  ;;  %1755 = vmatprep.subr.mxu0 %v44_v17  ;;  %v129_v38 = vld [vmem:[#allocation2 + $0x1] sm:$0xff]  ;;  %v130_v39 = vld [vmem:[#allocation2 + $0x9] sm:$0xff]  ;;  %v1433_v49 = vld [vmem:[%s3087_s1 + $0x1d8] sm:$0xff] }
  0x11   :  { %1790 = vmatprep.subr.mxu1 %v1398_v18  ;;  %1756 = vmatpush3.msra.mxu0 %v44_v17  ;;  %v1434_v47 = vld [vmem:[%s3087_s1 + $0x1e0] sm:$0xff]  ;;  %v1416_v48 = vld [vmem:[%s3087_s1 + $0x150] sm:$0xff]  ;;  %v1415_v50 = vld [vmem:[%s3087_s1 + $0x148] sm:$0xff] }
  0x12   :  { %1791 = vmatpush3.msra.mxu1 %v1398_v18  ;;  %1757 = vmatprep.subr.mxu0 %v43_v19  ;;  %v1432_v51 = vld [vmem:[%s3087_s1 + $0x1d0] sm:$0xff]  ;;  %v1414_v52 = vld [vmem:[%s3087_s1 + $0x140] sm:$0xff]  ;;  %v1431_v53 = vld [vmem:[%s3087_s1 + $0x1c8] sm:$0xff] }
  0x13   :  { %1792 = vmatprep.subr.mxu1 %v1397_v20  ;;  %1758 = vmatpush3.msra.mxu0 %v43_v19  ;;  %v1413_v54 = vld [vmem:[%s3087_s1 + $0x138] sm:$0xff]  ;;  %v1430_v55 = vld [vmem:[%s3087_s1 + $0x1c0] sm:$0xff]  ;;  %v1412_v56 = vld [vmem:[%s3087_s1 + $0x130] sm:$0xff] }
  0x14   :  { %1793 = vmatpush3.msra.mxu1 %v1397_v20  ;;  %1759 = vmatprep.subr.mxu0 %v42_v21  ;;  %v1429_v57 = vld [vmem:[%s3087_s1 + $0x1b8] sm:$0xff]  ;;  %v1411_v58 = vld [vmem:[%s3087_s1 + $0x128] sm:$0xff]  ;;  %v1428_v59 = vld [vmem:[%s3087_s1 + $0x1b0] sm:$0xff] }
  0x15   :  { %1794 = vmatprep.subr.mxu1 %v1396_v22  ;;  %1760 = vmatpush3.msra.mxu0 %v42_v21  ;;  %v1410_v60 = vld [vmem:[%s3087_s1 + $0x120] sm:$0xff]  ;;  %v1427_v61 = vld [vmem:[%s3087_s1 + $0x1a8] sm:$0xff]  ;;  %v1409_v62 = vld [vmem:[%s3087_s1 + $0x118] sm:$0xff] }
  0x16   :  { %1795 = vmatpush3.msra.mxu1 %v1396_v22  ;;  %1761 = vmatprep.subr.mxu0 %v41_v23  ;;  %v1426_v63 = vld [vmem:[%s3087_s1 + $0x1a0] sm:$0xff]  ;;  %v1408_v0 = vld [vmem:[%s3087_s1 + $0x110] sm:$0xff]  ;;  %v1425_v1 = vld [vmem:[%s3087_s1 + $0x198] sm:$0xff] }
  0x17   :  { %1796 = vmatprep.subr.mxu1 %v1395_v24  ;;  %1762 = vmatpush3.msra.mxu0 %v41_v23  ;;  %v1407_v2 = vld [vmem:[%s3087_s1 + $0x108] sm:$0xff]  ;;  %v1424_v4 = vld [vmem:[%s3087_s1 + $0x190] sm:$0xff]  ;;  %v1406_v5 = vld [vmem:[%s3087_s1 + $0x100] sm:$0xff] }
  0x18   :  { %1797 = vmatpush3.msra.mxu1 %v1395_v24  ;;  %1763 = vmatprep.subr.mxu0 %v40_v25  ;;  %v1423_v6 = vld [vmem:[%s3087_s1 + $0x188] sm:$0xff]  ;;  %v1422_v9 = vld [vmem:[%s3087_s1 + $0x180] sm:$0xff]  ;;  %v1453_v10 = vld [vmem:[%s3087_s1 + $0x278] sm:$0xff] }
  0x19   :  { %1798 = vmatprep.subr.mxu1 %v1394_v26  ;;  %1764 = vmatpush3.msra.mxu0 %v40_v25  ;;  %v225_v7 = vld [vmem:[#allocation2 + $0x2] sm:$0xff]  ;;  %v226_v8 = vld [vmem:[#allocation2 + $0xa] sm:$0xff]  ;;  %v1469_v12 = vld [vmem:[%s3087_s1 + $0x2f8] sm:$0xff] }
  0x1a   :  { %1799 = vmatpush3.msra.mxu1 %v1394_v26  ;;  %1765 = vmatprep.subr.mxu0 %v39_v27  ;;  %v1452_v11 = vld [vmem:[%s3087_s1 + $0x270] sm:$0xff]  ;;  %v1451_v13 = vld [vmem:[%s3087_s1 + $0x268] sm:$0xff]  ;;  %v1450_v17 = vld [vmem:[%s3087_s1 + $0x260] sm:$0xff] }
  0x1b   :  { %1800 = vmatprep.subr.mxu1 %v1393_v28  ;;  %1766 = vmatpush3.msra.mxu0 %v39_v27  ;;  %v1468_v14 = vld [vmem:[%s3087_s1 + $0x2f0] sm:$0xff]  ;;  %v1466_v18 = vld [vmem:[%s3087_s1 + $0x2e0] sm:$0xff]  ;;  %v1465_v20 = vld [vmem:[%s3087_s1 + $0x2d8] sm:$0xff] }
  0x1c   :  { %1801 = vmatpush3.msra.mxu1 %v1393_v28  ;;  %1767 = vmatprep.subr.mxu0 %v38_v29  ;;  %v1448_v19 = vld [vmem:[%s3087_s1 + $0x250] sm:$0xff]  ;;  %v1447_v21 = vld [vmem:[%s3087_s1 + $0x248] sm:$0xff]  ;;  %v1446_v23 = vld [vmem:[%s3087_s1 + $0x240] sm:$0xff] }
  0x1d   :  { %1802 = vmatprep.subr.mxu1 %v1392_v30  ;;  %1768 = vmatpush3.msra.mxu0 %v38_v29  ;;  %v1464_v22 = vld [vmem:[%s3087_s1 + $0x2d0] sm:$0xff]  ;;  %v1463_v24 = vld [vmem:[%s3087_s1 + $0x2c8] sm:$0xff]  ;;  %v1445_v25 = vld [vmem:[%s3087_s1 + $0x238] sm:$0xff] }
  0x1e   :  { %1803 = vmatpush3.msra.mxu1 %v1392_v30  ;;  %1769 = vmatprep.subr.mxu0 %v37_v31  ;;  %v1462_v26 = vld [vmem:[%s3087_s1 + $0x2c0] sm:$0xff]  ;;  %v1444_v27 = vld [vmem:[%s3087_s1 + $0x230] sm:$0xff]  ;;  %v1461_v28 = vld [vmem:[%s3087_s1 + $0x2b8] sm:$0xff] }
  0x1f   :  { %1804 = vmatprep.subr.mxu1 %v1391_v32  ;;  %1770 = vmatpush3.msra.mxu0 %v37_v31  ;;  %v1443_v29 = vld [vmem:[%s3087_s1 + $0x228] sm:$0xff]  ;;  %v1460_v30 = vld [vmem:[%s3087_s1 + $0x2b0] sm:$0xff]  ;;  %v1442_v31 = vld [vmem:[%s3087_s1 + $0x220] sm:$0xff] }
  0x20   :  { %1773 = vmatprep.mubr.f32.mxu0 %v34_v33  ;;  %1771 = vmatprep.subr.mxu0 %v36_v34  ;;  %v1441_v33 = vld [vmem:[%s3087_s1 + $0x218] sm:$0xff] }
  0x21   :  { %1805 = vmatpush3.msra.mxu1 %v1391_v32  ;;  %1772 = vmatpush3.msra.mxu0 %v36_v34  ;;  %v1459_v32 = vld [vmem:[%s3087_s1 + $0x2a8] sm:$0xff]  ;;  %v1458_v34 = vld [vmem:[%s3087_s1 + $0x2a0] sm:$0xff] }
  0x22   :  { %1806 = vmatprep.subr.mxu1 %v1390_v35  ;;  %1774 = vmatmul.mubr.f32.vlgmr.msra.gmra.mxu0 %v35_v36  ;;  %v1457_v36 = vld [vmem:[%s3087_s1 + $0x298] sm:$0xff] }
  0x23   :  { %1811 = vmatprep.subr.mxu0 %v1421_v37  ;;  %1807 = vmatpush3.msra.mxu1 %v1390_v35  ;;  %v1440_v35 = vld [vmem:[%s3087_s1 + $0x210] sm:$0xff] }
  0x24   :  { %1808 = vmatprep.mubr.f32.mxu1 %v129_v38  ;;  %1812 = vmatpush3.msra.mxu0 %v1421_v37  ;;  %v1439_v37 = vld [vmem:[%s3087_s1 + $0x208] sm:$0xff]  ;;  %v1456_v38 = vld [vmem:[%s3087_s1 + $0x290] sm:$0xff] }
  0x25   :  { %1809 = vmatmul.mubr.f32.vlgmr.msra.gmra.mxu1 %v130_v39  ;;  %1813 = vmatprep.subr.mxu0 %v1420_v40  ;;  %v1438_v39 = vld [vmem:[%s3087_s1 + $0x200] sm:$0xff] }
  0x26   :  { %1846 = vmatprep.subr.mxu1 %v1437_v41  ;;  %1814 = vmatpush3.msra.mxu0 %v1420_v40  ;;  %v1455_v40 = vld [vmem:[%s3087_s1 + $0x288] sm:$0xff] }
  0x27   :  { %1847 = vmatpush3.msra.mxu1 %v1437_v41  ;;  %1815 = vmatprep.subr.mxu0 %v1419_v42  ;;  %v417_v41 = vld [vmem:[#allocation2 + $0x4] sm:$0xff] }
  0x28   :  { %1848 = vmatprep.subr.mxu1 %v1436_v43  ;;  %1816 = vmatpush3.msra.mxu0 %v1419_v42  ;;  %v418_v42 = vld [vmem:[#allocation2 + $0xc] sm:$0xff] }
  0x29   :  { %1849 = vmatpush3.msra.mxu1 %v1436_v43  ;;  %1817 = vmatprep.subr.mxu0 %v1418_v44  ;;  %v1454_v43 = vld [vmem:[%s3087_s1 + $0x280] sm:$0xff] }
  0x2a   :  { %1850 = vmatprep.subr.mxu1 %v1435_v45  ;;  %1818 = vmatpush3.msra.mxu0 %v1418_v44  ;;  %v1485_v44 = vld [vmem:[%s3087_s1 + $0x378] sm:$0xff] }
  0x2b   :  { %1851 = vmatpush3.msra.mxu1 %v1435_v45  ;;  %1819 = vmatprep.subr.mxu0 %v1417_v46  ;;  %v513_v45 = vld [vmem:[#allocation2 + $0x5] sm:$0xff] }
  0x2c   :  { %1852 = vmatprep.subr.mxu1 %v1434_v47  ;;  %1820 = vmatpush3.msra.mxu0 %v1417_v46  ;;  %v514_v46 = vld [vmem:[#allocation2 + $0xd] sm:$0xff] }
  0x2d   :  { %1853 = vmatpush3.msra.mxu1 %v1434_v47  ;;  %1821 = vmatprep.subr.mxu0 %v1416_v48  ;;  %v1484_v47 = vld [vmem:[%s3087_s1 + $0x370] sm:$0xff] }
  0x2e   :  { %1854 = vmatprep.subr.mxu1 %v1433_v49  ;;  %1822 = vmatpush3.msra.mxu0 %v1416_v48  ;;  %v609_v48 = vld [vmem:[#allocation2 + $0x6] sm:$0xff] }
  0x2f   :  { %1855 = vmatpush3.msra.mxu1 %v1433_v49  ;;  %1823 = vmatprep.subr.mxu0 %v1415_v50  ;;  %v1483_v49 = vld [vmem:[%s3087_s1 + $0x368] sm:$0xff] }
  0x30   :  { %1856 = vmatprep.subr.mxu1 %v1432_v51  ;;  %1824 = vmatpush3.msra.mxu0 %v1415_v50  ;;  %v1482_v50 = vld [vmem:[%s3087_s1 + $0x360] sm:$0xff] }
  0x31   :  { %1857 = vmatpush3.msra.mxu1 %v1432_v51  ;;  %1825 = vmatprep.subr.mxu0 %v1414_v52  ;;  %v1481_v51 = vld [vmem:[%s3087_s1 + $0x358] sm:$0xff] }
  0x32   :  { %1858 = vmatprep.subr.mxu1 %v1431_v53  ;;  %1826 = vmatpush3.msra.mxu0 %v1414_v52  ;;  %v1480_v52 = vld [vmem:[%s3087_s1 + $0x350] sm:$0xff] }
  0x33   :  { %1859 = vmatpush3.msra.mxu1 %v1431_v53  ;;  %1827 = vmatprep.subr.mxu0 %v1413_v54  ;;  %v1479_v53 = vld [vmem:[%s3087_s1 + $0x348] sm:$0xff] }
  0x34   :  { %1860 = vmatprep.subr.mxu1 %v1430_v55  ;;  %1828 = vmatpush3.msra.mxu0 %v1413_v54  ;;  %v1478_v54 = vld [vmem:[%s3087_s1 + $0x340] sm:$0xff] }
  0x35   :  { %1861 = vmatpush3.msra.mxu1 %v1430_v55  ;;  %1829 = vmatprep.subr.mxu0 %v1412_v56  ;;  %v1477_v55 = vld [vmem:[%s3087_s1 + $0x338] sm:$0xff] }
  0x36   :  { %1862 = vmatprep.subr.mxu1 %v1429_v57  ;;  %1830 = vmatpush3.msra.mxu0 %v1412_v56  ;;  %v1476_v56 = vld [vmem:[%s3087_s1 + $0x330] sm:$0xff] }
  0x37   :  { %1863 = vmatpush3.msra.mxu1 %v1429_v57  ;;  %1831 = vmatprep.subr.mxu0 %v1411_v58  ;;  %v1475_v57 = vld [vmem:[%s3087_s1 + $0x328] sm:$0xff] }
  0x38   :  { %1864 = vmatprep.subr.mxu1 %v1428_v59  ;;  %1832 = vmatpush3.msra.mxu0 %v1411_v58  ;;  %v1474_v58 = vld [vmem:[%s3087_s1 + $0x320] sm:$0xff] }
  0x39   :  { %1865 = vmatpush3.msra.mxu1 %v1428_v59  ;;  %1833 = vmatprep.subr.mxu0 %v1410_v60  ;;  %v1473_v59 = vld [vmem:[%s3087_s1 + $0x318] sm:$0xff] }
  0x3a   :  { %1866 = vmatprep.subr.mxu1 %v1427_v61  ;;  %1834 = vmatpush3.msra.mxu0 %v1410_v60  ;;  %v1472_v60 = vld [vmem:[%s3087_s1 + $0x310] sm:$0xff] }
  0x3b   :  { %1867 = vmatpush3.msra.mxu1 %v1427_v61  ;;  %1835 = vmatprep.subr.mxu0 %v1409_v62  ;;  %v1471_v61 = vld [vmem:[%s3087_s1 + $0x308] sm:$0xff] }
  0x3c   :  { %1868 = vmatprep.subr.mxu1 %v1426_v63  ;;  %1836 = vmatpush3.msra.mxu0 %v1409_v62  ;;  %v1470_v62 = vld [vmem:[%s3087_s1 + $0x300] sm:$0xff] }
  0x3d   :  { %1869 = vmatpush3.msra.mxu1 %v1426_v63  ;;  %1837 = vmatprep.subr.mxu0 %v1408_v0  ;;  %v610_v63 = vld [vmem:[#allocation2 + $0xe] sm:$0xff] }
  0x3e   :  { %1870 = vmatprep.subr.mxu1 %v1425_v1  ;;  %1838 = vmatpush3.msra.mxu0 %v1408_v0  ;;  %v1501_v0 = vld [vmem:[%s3087_s1 + $0x3f8] sm:$0xff] }
  0x3f   :  { %1871 = vmatpush3.msra.mxu1 %v1425_v1  ;;  %1839 = vmatprep.subr.mxu0 %v1407_v2  ;;  %v1500_v1 = vld [vmem:[%s3087_s1 + $0x3f0] sm:$0xff] }
  0x40   :  { %1872 = vmatprep.subr.mxu1 %v1424_v4  ;;  %1840 = vmatpush3.msra.mxu0 %v1407_v2  ;;  %v1499_v2 = vld [vmem:[%s3087_s1 + $0x3e8] sm:$0xff] }
  0x41   :  { %1873 = vmatpush3.msra.mxu1 %v1424_v4  ;;  %1841 = vmatprep.subr.mxu0 %v1406_v5  ;;  %v1498_v4 = vld [vmem:[%s3087_s1 + $0x3e0] sm:$0xff] }
  0x42   :  { %1874 = vmatprep.subr.mxu1 %v1423_v6  ;;  %1842 = vmatpush3.msra.mxu0 %v1406_v5  ;;  %v1497_v5 = vld [vmem:[%s3087_s1 + $0x3d8] sm:$0xff] }
  0x43   :  { %1843 = vmatprep.mubr.f32.mxu0 %v225_v7  ;;  %1875 = vmatpush3.msra.mxu1 %v1423_v6  ;;  %v1496_v6 = vld [vmem:[%s3087_s1 + $0x3d0] sm:$0xff]  ;;  %v1495_v7 = vld [vmem:[%s3087_s1 + $0x3c8] sm:$0xff] }
  0x44   :  { %1844 = vmatmul.mubr.f32.vlgmr.msra.gmra.mxu0 %v226_v8  ;;  %1876 = vmatprep.subr.mxu1 %v1422_v9  ;;  %v1494_v8 = vld [vmem:[%s3087_s1 + $0x3c0] sm:$0xff] }
  0x45   :  { %1881 = vmatprep.subr.mxu0 %v1453_v10  ;;  %1877 = vmatpush3.msra.mxu1 %v1422_v9  ;;  %v1493_v9 = vld [vmem:[%s3087_s1 + $0x3b8] sm:$0xff] }
  0x46   :  { %1878 = vmatprep.mubr.f32.mxu1 %v2189_v15  ;;  %1882 = vmatpush3.msra.mxu0 %v1453_v10  ;;  %v1467_v15 = vld [vmem:[%s3087_s1 + $0x2e8] sm:$0xff]  ;;  %v1492_v10 = vld [vmem:[%s3087_s1 + $0x3b0] sm:$0xff] }
  0x47   :  { %1879 = vmatmul.mubr.f32.vlgmr.msra.gmra.mxu1 %v2194_v16  ;;  %1883 = vmatprep.subr.mxu0 %v1452_v11  ;;  %v1449_v16 = vld [vmem:[%s3087_s1 + $0x258] sm:$0xff] }
  0x48   :  { %1916 = vmatprep.subr.mxu1 %v1469_v12  ;;  %1884 = vmatpush3.msra.mxu0 %v1452_v11  ;;  %v1491_v11 = vld [vmem:[%s3087_s1 + $0x3a8] sm:$0xff] }
  0x49   :  { %1917 = vmatpush3.msra.mxu1 %v1469_v12  ;;  %1885 = vmatprep.subr.mxu0 %v1451_v13  ;;  %v1490_v12 = vld [vmem:[%s3087_s1 + $0x3a0] sm:$0xff] }
  0x4a   :  { %1918 = vmatprep.subr.mxu1 %v1468_v14  ;;  %1886 = vmatpush3.msra.mxu0 %v1451_v13  ;;  %v1489_v13 = vld [vmem:[%s3087_s1 + $0x398] sm:$0xff] }
  0x4b   :  { %1919 = vmatpush3.msra.mxu1 %v1468_v14  ;;  %1887 = vmatprep.subr.mxu0 %v1450_v17  ;;  %v1488_v14 = vld [vmem:[%s3087_s1 + $0x390] sm:$0xff] }
  0x4c   :  { %1920 = vmatprep.subr.mxu1 %v1467_v15  ;;  %1888 = vmatpush3.msra.mxu0 %v1450_v17  ;;  %v1487_v17 = vld [vmem:[%s3087_s1 + $0x388] sm:$0xff] }
  0x4d   :  { %1921 = vmatpush3.msra.mxu1 %v1467_v15  ;;  %1889 = vmatprep.subr.mxu0 %v1449_v16  ;;  %v1486_v15 = vld [vmem:[%s3087_s1 + $0x380] sm:$0xff] }
  0x4e   :  { %1922 = vmatprep.subr.mxu1 %v1466_v18  ;;  %1890 = vmatpush3.msra.mxu0 %v1449_v16 }
  0x4f   :  { %1923 = vmatpush3.msra.mxu1 %v1466_v18  ;;  %1891 = vmatprep.subr.mxu0 %v1448_v19  ;;  %v1389_v18 = vld [vmem:[%s3089_s4] ss:$0 sm:$0xff] }
  0x50   :  { %1924 = vmatprep.subr.mxu1 %v1465_v20  ;;  %1892 = vmatpush3.msra.mxu0 %v1448_v19 }
  0x51   :  { %1925 = vmatpush3.msra.mxu1 %v1465_v20  ;;  %1893 = vmatprep.subr.mxu0 %v1447_v21 }
  0x52   :  { %1926 = vmatprep.subr.mxu1 %v1464_v22  ;;  %1894 = vmatpush3.msra.mxu0 %v1447_v21 }
  0x53   :  { %1927 = vmatpush3.msra.mxu1 %v1464_v22  ;;  %1895 = vmatprep.subr.mxu0 %v1446_v23 }
  0x54   :  { %1928 = vmatprep.subr.mxu1 %v1463_v24  ;;  %1896 = vmatpush3.msra.mxu0 %v1446_v23 }
  0x55   :  { %1929 = vmatpush3.msra.mxu1 %v1463_v24  ;;  %1897 = vmatprep.subr.mxu0 %v1445_v25 }
  0x56   :  { %1930 = vmatprep.subr.mxu1 %v1462_v26  ;;  %1898 = vmatpush3.msra.mxu0 %v1445_v25 }
  0x57   :  { %1931 = vmatpush3.msra.mxu1 %v1462_v26  ;;  %1899 = vmatprep.subr.mxu0 %v1444_v27 }
  0x58   :  { %1932 = vmatprep.subr.mxu1 %v1461_v28  ;;  %1900 = vmatpush3.msra.mxu0 %v1444_v27 }
  0x59   :  { %1933 = vmatpush3.msra.mxu1 %v1461_v28  ;;  %1901 = vmatprep.subr.mxu0 %v1443_v29 }
  0x5a   :  { %1934 = vmatprep.subr.mxu1 %v1460_v30  ;;  %1902 = vmatpush3.msra.mxu0 %v1443_v29 }
  0x5b   :  { %1935 = vmatpush3.msra.mxu1 %v1460_v30  ;;  %1903 = vmatprep.subr.mxu0 %v1442_v31 }
  0x5c   :  { %1936 = vmatprep.subr.mxu1 %v1459_v32  ;;  %1904 = vmatpush3.msra.mxu0 %v1442_v31 }
  0x5d   :  { %1937 = vmatpush3.msra.mxu1 %v1459_v32  ;;  %1905 = vmatprep.subr.mxu0 %v1441_v33 }
  0x5e   :  { %1938 = vmatprep.subr.mxu1 %v1458_v34  ;;  %1906 = vmatpush3.msra.mxu0 %v1441_v33 }
  0x5f   :  { %1939 = vmatpush3.msra.mxu1 %v1458_v34  ;;  %1907 = vmatprep.subr.mxu0 %v1440_v35 }
  0x60   :  { %1940 = vmatprep.subr.mxu1 %v1457_v36  ;;  %1908 = vmatpush3.msra.mxu0 %v1440_v35 }
  0x61   :  { %1941 = vmatpush3.msra.mxu1 %v1457_v36  ;;  %1909 = vmatprep.subr.mxu0 %v1439_v37 }
  0x62   :  { %1942 = vmatprep.subr.mxu1 %v1456_v38  ;;  %1910 = vmatpush3.msra.mxu0 %v1439_v37 }
  0x63   :  { %1943 = vmatpush3.msra.mxu1 %v1456_v38  ;;  %1911 = vmatprep.subr.mxu0 %v1438_v39 }
  0x64   :  { %1944 = vmatprep.subr.mxu1 %v1455_v40  ;;  %1912 = vmatpush3.msra.mxu0 %v1438_v39 }
  0x65   :  { %1913 = vmatprep.mubr.f32.mxu0 %v417_v41  ;;  %1945 = vmatpush3.msra.mxu1 %v1455_v40 }
  0x66   :  { %1914 = vmatmul.mubr.f32.vlgmr.msra.gmra.mxu0 %v418_v42  ;;  %1946 = vmatprep.subr.mxu1 %v1454_v43 }
  0x67   :  { %1951 = vmatprep.subr.mxu0 %v1485_v44  ;;  %1947 = vmatpush3.msra.mxu1 %v1454_v43 }
  0x68   :  { %1948 = vmatprep.mubr.f32.mxu1 %v513_v45  ;;  %1952 = vmatpush3.msra.mxu0 %v1485_v44 }
  0x69   :  { %1949 = vmatmul.mubr.f32.vlgmr.msra.gmra.mxu1 %v514_v46  ;;  %1953 = vmatprep.subr.mxu0 %v1484_v47  ;;  %v941_v46 = vld [vmem:[%s3090_s2 + $0x1e8] sm:$0xff] }
  0x6a   :  { %1983 = vmatprep.mubr.f32.mxu0 %v609_v48  ;;  %1954 = vmatpush3.msra.mxu0 %v1484_v47  ;;  %v943_v47 = vld [vmem:[%s3090_s2 + $0x1f8] sm:$0xff]  ;;  %v940_v48 = vld [vmem:[%s3090_s2 + $0x1e0] sm:$0xff] }
  0x6b   :  { %1955 = vmatprep.subr.mxu0 %v1483_v49  ;;  %1986 = vmatprep.subr.mxu1 %v1501_v0 }
  0x6c   :  { %1956 = vmatpush3.msra.mxu0 %v1483_v49  ;;  %1987 = vmatpush3.msra.mxu1 %v1501_v0  ;;  %v937_v49 = vld [vmem:[%s3090_s2 + $0x1c8] sm:$0xff] }
  0x6d   :  { %1957 = vmatprep.subr.mxu0 %v1482_v50  ;;  %1988 = vmatprep.subr.mxu1 %v1500_v1 }
  0x6e   :  { %1958 = vmatpush3.msra.mxu0 %v1482_v50  ;;  %1989 = vmatpush3.msra.mxu1 %v1500_v1  ;;  %v936_v50 = vld [vmem:[%s3090_s2 + $0x1c0] sm:$0xff] }
  0x6f   :  { %1959 = vmatprep.subr.mxu0 %v1481_v51  ;;  %1990 = vmatprep.subr.mxu1 %v1499_v2 }
  0x70   :  { %1960 = vmatpush3.msra.mxu0 %v1481_v51  ;;  %1991 = vmatpush3.msra.mxu1 %v1499_v2  ;;  %v933_v51 = vld [vmem:[%s3090_s2 + $0x1a8] sm:$0xff] }
  0x71   :  { %1961 = vmatprep.subr.mxu0 %v1480_v52  ;;  %1992 = vmatprep.subr.mxu1 %v1498_v4 }
  0x72   :  { %1962 = vmatpush3.msra.mxu0 %v1480_v52  ;;  %1993 = vmatpush3.msra.mxu1 %v1498_v4  ;;  %v932_v52 = vld [vmem:[%s3090_s2 + $0x1a0] sm:$0xff] }
  0x73   :  { %1963 = vmatprep.subr.mxu0 %v1479_v53  ;;  %1994 = vmatprep.subr.mxu1 %v1497_v5 }
  0x74   :  { %1964 = vmatpush3.msra.mxu0 %v1479_v53  ;;  %1995 = vmatpush3.msra.mxu1 %v1497_v5  ;;  %v929_v53 = vld [vmem:[%s3090_s2 + $0x188] sm:$0xff] }
  0x75   :  { %1965 = vmatprep.subr.mxu0 %v1478_v54  ;;  %1996 = vmatprep.subr.mxu1 %v1496_v6 }
  0x76   :  { %1966 = vmatpush3.msra.mxu0 %v1478_v54  ;;  %1997 = vmatpush3.msra.mxu1 %v1496_v6  ;;  %v928_v54 = vld [vmem:[%s3090_s2 + $0x180] sm:$0xff] }
  0x77   :  { %1967 = vmatprep.subr.mxu0 %v1477_v55  ;;  %1998 = vmatprep.subr.mxu1 %v1495_v7 }
  0x78   :  { %1968 = vmatpush3.msra.mxu0 %v1477_v55  ;;  %1999 = vmatpush3.msra.mxu1 %v1495_v7  ;;  %v925_v55 = vld [vmem:[%s3090_s2 + $0x168] sm:$0xff] }
  0x79   :  { %1969 = vmatprep.subr.mxu0 %v1476_v56  ;;  %2000 = vmatprep.subr.mxu1 %v1494_v8 }
  0x7a   :  { %1970 = vmatpush3.msra.mxu0 %v1476_v56  ;;  %2001 = vmatpush3.msra.mxu1 %v1494_v8  ;;  %v924_v56 = vld [vmem:[%s3090_s2 + $0x160] sm:$0xff] }
  0x7b   :  { %1971 = vmatprep.subr.mxu0 %v1475_v57  ;;  %2002 = vmatprep.subr.mxu1 %v1493_v9 }
  0x7c   :  { %1972 = vmatpush3.msra.mxu0 %v1475_v57  ;;  %2003 = vmatpush3.msra.mxu1 %v1493_v9  ;;  %v921_v57 = vld [vmem:[%s3090_s2 + $0x148] sm:$0xff] }
  0x7d   :  { %1973 = vmatprep.subr.mxu0 %v1474_v58  ;;  %2004 = vmatprep.subr.mxu1 %v1492_v10 }
  0x7e   :  { %1974 = vmatpush3.msra.mxu0 %v1474_v58  ;;  %2005 = vmatpush3.msra.mxu1 %v1492_v10 }
  0x7f   :  { %1975 = vmatprep.subr.mxu0 %v1473_v59  ;;  %2006 = vmatprep.subr.mxu1 %v1491_v11 }
  0x80   :  { %1976 = vmatpush3.msra.mxu0 %v1473_v59  ;;  %2007 = vmatpush3.msra.mxu1 %v1491_v11 }
  0x81   :  { %1977 = vmatprep.subr.mxu0 %v1472_v60  ;;  %2008 = vmatprep.subr.mxu1 %v1490_v12 }
  0x82   :  { %1978 = vmatpush3.msra.mxu0 %v1472_v60  ;;  %2009 = vmatpush3.msra.mxu1 %v1490_v12 }
  0x83   :  { %1979 = vmatprep.subr.mxu0 %v1471_v61  ;;  %2010 = vmatprep.subr.mxu1 %v1489_v13 }
  0x84   :  { %1980 = vmatpush3.msra.mxu0 %v1471_v61  ;;  %2011 = vmatpush3.msra.mxu1 %v1489_v13 }
  0x85   :  { %1981 = vmatprep.subr.mxu0 %v1470_v62  ;;  %2012 = vmatprep.subr.mxu1 %v1488_v14 }
  0x86   :  { %1982 = vmatpush3.msra.mxu0 %v1470_v62  ;;  %2013 = vmatpush3.msra.mxu1 %v1488_v14 }
  0x87   :  { %1984 = vmatmul.mubr.f32.vlgmr.msra.gmra.mxu0 %v610_v63  ;;  %2021 = vmatprep.subr.mxu0 %v1501_v0 }
  0x88   :  { %2022 = vmatpush3.msra.mxu0 %v1501_v0  ;;  %2014 = vmatprep.subr.mxu1 %v1487_v17  ;;  %v942_v0 = vld [vmem:[%s3090_s2 + $0x1f0] sm:$0xff] }
  0x89   :  { %2023 = vmatprep.subr.mxu0 %v1500_v1  ;;  %2015 = vmatpush3.msra.mxu1 %v1487_v17 }
  0x8a   :  { %2024 = vmatpush3.msra.mxu0 %v1500_v1  ;;  %2016 = vmatprep.subr.mxu1 %v1486_v15  ;;  %v939_v1 = vld [vmem:[%s3090_s2 + $0x1d8] sm:$0xff] }
  0x8b   :  { %2025 = vmatprep.subr.mxu0 %v1499_v2  ;;  %2017 = vmatpush3.msra.mxu1 %v1486_v15 }
  0x8c   :  { %2026 = vmatpush3.msra.mxu0 %v1499_v2  ;;  %966 = vmatprep.subr.mxu1 %v941_v46  ;;  %v938_v2 = vld [vmem:[%s3090_s2 + $0x1d0] sm:$0xff]  ;;  %v887_v46 = vld [vmem:[%s3090_s2 + $0x38] sm:$0xff] }
  0x8d   :  { %2027 = vmatprep.subr.mxu0 %v1498_v4 }
  0x8e   :  { %2028 = vmatpush3.msra.mxu0 %v1498_v4  ;;  %v935_v4 = vld [vmem:[%s3090_s2 + $0x1b8] sm:$0xff] }
  0x8f   :  { %2029 = vmatprep.subr.mxu0 %v1497_v5 }
  0x90   :  { %2030 = vmatpush3.msra.mxu0 %v1497_v5  ;;  %v934_v5 = vld [vmem:[%s3090_s2 + $0x1b0] sm:$0xff] }
  0x91   :  { %2031 = vmatprep.subr.mxu0 %v1496_v6 }
  0x92   :  { %2032 = vmatpush3.msra.mxu0 %v1496_v6  ;;  %v931_v6 = vld [vmem:[%s3090_s2 + $0x198] sm:$0xff] }
  0x93   :  { %2033 = vmatprep.subr.mxu0 %v1495_v7 }
  0x94   :  { %2034 = vmatpush3.msra.mxu0 %v1495_v7  ;;  %v930_v7 = vld [vmem:[%s3090_s2 + $0x190] sm:$0xff] }
  0x95   :  { %2035 = vmatprep.subr.mxu0 %v1494_v8 }
  0x96   :  { %2036 = vmatpush3.msra.mxu0 %v1494_v8  ;;  %v927_v8 = vld [vmem:[%s3090_s2 + $0x178] sm:$0xff] }
  0x97   :  { %2037 = vmatprep.subr.mxu0 %v1493_v9 }
  0x98   :  { %2038 = vmatpush3.msra.mxu0 %v1493_v9  ;;  %v926_v9 = vld [vmem:[%s3090_s2 + $0x170] sm:$0xff] }
  0x99   :  { %2039 = vmatprep.subr.mxu0 %v1492_v10 }
  0x9a   :  { %2040 = vmatpush3.msra.mxu0 %v1492_v10  ;;  %v923_v10 = vld [vmem:[%s3090_s2 + $0x158] sm:$0xff] }
  0x9b   :  { %2041 = vmatprep.subr.mxu0 %v1491_v11 }
  0x9c   :  { %2042 = vmatpush3.msra.mxu0 %v1491_v11  ;;  %v920_v11 = vld [vmem:[%s3090_s2 + $0x140] sm:$0xff] }
  0x9d   :  { %2043 = vmatprep.subr.mxu0 %v1490_v12 }
  0x9e   :  { %2044 = vmatpush3.msra.mxu0 %v1490_v12  ;;  %v922_v12 = vld [vmem:[%s3090_s2 + $0x150] sm:$0xff] }
  0x9f   :  { %2045 = vmatprep.subr.mxu0 %v1489_v13 }
  0xa0   :  { %2046 = vmatpush3.msra.mxu0 %v1489_v13  ;;  %v917_v13 = vld [vmem:[%s3090_s2 + $0x128] sm:$0xff] }
  0xa1   :  { %2047 = vmatprep.subr.mxu0 %v1488_v14 }
  0xa2   :  { %2048 = vmatpush3.msra.mxu0 %v1488_v14  ;;  %v919_v14 = vld [vmem:[%s3090_s2 + $0x138] sm:$0xff] }
  0xa3   :  { %2049 = vmatprep.subr.mxu0 %v1487_v17 }
  0xa4   :  { %2050 = vmatpush3.msra.mxu0 %v1487_v17  ;;  %v916_v17 = vld [vmem:[%s3090_s2 + $0x120] sm:$0xff] }
  0xa5   :  { %2051 = vmatprep.subr.mxu0 %v1486_v15 }
  0xa6   :  { %2052 = vmatpush3.msra.mxu0 %v1486_v15  ;;  %v918_v15 = vld [vmem:[%s3090_s2 + $0x130] sm:$0xff] }
  0xa7   :  { %1043 = vmatprep.subr.mxu0 %v943_v47  ;;  %v884_v47 = vld [vmem:[%s3090_s2 + $0x20] sm:$0xff] }
  0xe2   :  { %v1775_v16 = vpop.f32.mrf.mxu0 }
  0xe3   :  { %v128_v23 = vadd.f32 %v1775_v16, %v1389_v18  ;;  %v913_v16 = vld [vmem:[%s3090_s2 + $0x108] sm:$0xff] }
  0xe4   :  { %v118_v19 = vpop.f32.mrf.mxu0 }
  0xe5   :  { %v1810_v20 = vpop.f32.mrf.mxu1  ;;  %v127_v22 = vadd.f32 %v1389_v18, %v118_v19  ;;  %v915_v18 = vld [vmem:[%s3090_s2 + $0x118] sm:$0xff]  ;;  %v912_v19 = vld [vmem:[%s3090_s2 + $0x100] sm:$0xff] }
  0xe6   :  { %v224_v28 = vadd.f32 %v1810_v20, %v128_v23  ;;  %v914_v20 = vld [vmem:[%s3090_s2 + $0x110] sm:$0xff]  ;;  %v908_v23 = vld [vmem:[%s3090_s2 + $0xe0] sm:$0xff] }
  0xe7   :  { %v214_v24 = vpop.f32.mrf.mxu1 }
  0xe8   :  { %v223_v27 = vadd.f32 %v214_v24, %v127_v22  ;;  %v911_v22 = vld [vmem:[%s3090_s2 + $0xf8] sm:$0xff]  ;;  %v910_v24 = vld [vmem:[%s3090_s2 + $0xf0] sm:$0xff] }
 0x104   :  { %v1845_v21 = vpop.f32.mrf.mxu0 }
 0x105   :  { %v320_v31 = vadd.f32 %v1845_v21, %v224_v28  ;;  %v909_v21 = vld [vmem:[%s3090_s2 + $0xe8] sm:$0xff]  ;;  %v906_v28 = vld [vmem:[%s3090_s2 + $0xd0] sm:$0xff] }
 0x106   :  { %v310_v25 = vpop.f32.mrf.mxu0 }
 0x107   :  { %v1880_v26 = vpop.f32.mrf.mxu1  ;;  %v319_v30 = vadd.f32 %v310_v25, %v223_v27  ;;  %v905_v25 = vld [vmem:[%s3090_s2 + $0xc8] sm:$0xff]  ;;  %v904_v27 = vld [vmem:[%s3090_s2 + $0xc0] sm:$0xff] }
 0x108   :  { %v416_v36 = vadd.f32 %v1880_v26, %v320_v31  ;;  %v907_v26 = vld [vmem:[%s3090_s2 + $0xd8] sm:$0xff]  ;;  %v900_v31 = vld [vmem:[%s3090_s2 + $0xa0] sm:$0xff] }
 0x109   :  { %v406_v32 = vpop.f32.mrf.mxu1 }
 0x10a   :  { %v415_v35 = vadd.f32 %v406_v32, %v319_v30  ;;  %v903_v30 = vld [vmem:[%s3090_s2 + $0xb8] sm:$0xff]  ;;  %v902_v32 = vld [vmem:[%s3090_s2 + $0xb0] sm:$0xff] }
 0x126   :  { %v1915_v29 = vpop.f32.mrf.mxu0 }
 0x127   :  { %v512_v38 = vadd.f32 %v1915_v29, %v416_v36  ;;  %v901_v29 = vld [vmem:[%s3090_s2 + $0xa8] sm:$0xff]  ;;  %v898_v36 = vld [vmem:[%s3090_s2 + $0x90] sm:$0xff] }
 0x128   :  { %v502_v33 = vpop.f32.mrf.mxu0 }
 0x129   :  { %v1950_v34 = vpop.f32.mrf.mxu1  ;;  %v511_v37 = vadd.f32 %v502_v33, %v415_v35  ;;  %v897_v33 = vld [vmem:[%s3090_s2 + $0x88] sm:$0xff]  ;;  %v896_v35 = vld [vmem:[%s3090_s2 + $0x80] sm:$0xff] }
 0x12a   :  { %v608_v42 = vadd.f32 %v1950_v34, %v512_v38  ;;  %v899_v34 = vld [vmem:[%s3090_s2 + $0x98] sm:$0xff] }
 0x12b   :  { %v598_v39 = vpop.f32.mrf.mxu1  ;;  %v895_v38 = vld [vmem:[%s3090_s2 + $0x78] sm:$0xff] }
 0x12c   :  { %v607_v41 = vadd.f32 %v598_v39, %v511_v37  ;;  %v893_v37 = vld [vmem:[%s3090_s2 + $0x68] sm:$0xff]  ;;  %v892_v39 = vld [vmem:[%s3090_s2 + $0x60] sm:$0xff] }
 0x147   :  { %v1985_v40 = vpop.f32.mrf.mxu0 }
 0x148   :  { %v704_v45 = vadd.f32 %v1985_v40, %v608_v42  ;;  %v894_v40 = vld [vmem:[%s3090_s2 + $0x70] sm:$0xff]  ;;  %v891_v42 = vld [vmem:[%s3090_s2 + $0x58] sm:$0xff] }
 0x149   :  { %v694_v43 = vpop.f32.mrf.mxu0 }
 0x14a   :  { %v703_v44 = vadd.f32 %v694_v43, %v607_v41  ;;  %v889_v41 = vld [vmem:[%s3090_s2 + $0x48] sm:$0xff]  ;;  %v888_v43 = vld [vmem:[%s3090_s2 + $0x40] sm:$0xff] }
 0x14c   :  { %2018 = vmatprep.mubr.f32.mxu1 %v703_v44 }
 0x14d   :  { %2019 = vmatmul.mubr.f32.vlgmr.msra.gmra.mxu1 %v704_v45 }
 0x14e   :  { %1030 = vmatprep.mubr.f32.mxu1 %v2111_v3  ;;  %967 = vmatpush1.msra.mxu1 %v940_v48  ;;  %v886_v48 = vld [vmem:[%s3090_s2 + $0x30] sm:$0xff] }
 0x14f   :  { %968 = vmatprep.subr.mxu1 %v937_v49  ;;  %v881_v49 = vld [vmem:[%s3090_s2 + $0x8] sm:$0xff] }
 0x150   :  { %969 = vmatpush1.msra.mxu1 %v936_v50  ;;  %v883_v50 = vld [vmem:[%s3090_s2 + $0x18] sm:$0xff] }
 0x151   :  { %970 = vmatprep.subr.mxu1 %v933_v51  ;;  %v880_v51 = vld [vmem:[%s3090_s2] sm:$0xff] }
 0x152   :  { %971 = vmatpush1.msra.mxu1 %v932_v52  ;;  %v882_v52 = vld [vmem:[%s3090_s2 + $0x10] sm:$0xff] }
 0x153   :  { %972 = vmatprep.subr.mxu1 %v929_v53  ;;  %v1191_v53 = vld [vmem:[%s3091_s3 + $0xf8] sm:$0xff] }
 0x154   :  { %973 = vmatpush1.msra.mxu1 %v928_v54  ;;  %v2753_v54 = vld [vmem:[%s3091_s3 + $0x1f8] sm:$0xff] }
 0x155   :  { %974 = vmatprep.subr.mxu1 %v925_v55 }
 0x156   :  { %975 = vmatpush1.msra.mxu1 %v924_v56 }
 0x157   :  { %976 = vmatprep.subr.mxu1 %v921_v57 }
 0x158   :  { %977 = vmatpush1.msra.mxu1 %v920_v11  ;;  %v2814_v11 = vld [vmem:[%s3091_s3 + $0x1e0] sm:$0xff] }
 0x159   :  { %978 = vmatprep.subr.mxu1 %v917_v13  ;;  %v2823_v13 = vld [vmem:[%s3091_s3 + $0x160] sm:$0xff] }
 0x15a   :  { %979 = vmatpush1.msra.mxu1 %v916_v17  ;;  %v2832_v17 = vld [vmem:[%s3091_s3 + $0x1d8] sm:$0xff] }
 0x15b   :  { %980 = vmatprep.subr.mxu1 %v913_v16  ;;  %v2841_v16 = vld [vmem:[%s3091_s3 + $0x158] sm:$0xff] }
 0x15c   :  { %981 = vmatpush1.msra.mxu1 %v912_v19  ;;  %v2850_v19 = vld [vmem:[%s3091_s3 + $0x1d0] sm:$0xff] }
 0x15d   :  { %982 = vmatprep.subr.mxu1 %v909_v21  ;;  %v2859_v21 = vld [vmem:[%s3091_s3 + $0x150] sm:$0xff] }
 0x15e   :  { %983 = vmatpush1.msra.mxu1 %v908_v23  ;;  %v2868_v23 = vld [vmem:[%s3091_s3 + $0x1c8] sm:$0xff] }
 0x15f   :  { %984 = vmatprep.subr.mxu1 %v905_v25  ;;  %v2877_v25 = vld [vmem:[%s3091_s3 + $0x148] sm:$0xff] }
 0x160   :  { %985 = vmatpush1.msra.mxu1 %v904_v27  ;;  %v2886_v27 = vld [vmem:[%s3091_s3 + $0x1c0] sm:$0xff] }
 0x161   :  { %986 = vmatprep.subr.mxu1 %v901_v29  ;;  %v2895_v29 = vld [vmem:[%s3091_s3 + $0x140] sm:$0xff] }
 0x162   :  { %987 = vmatpush1.msra.mxu1 %v900_v31  ;;  %v2904_v31 = vld [vmem:[%s3091_s3 + $0x1b8] sm:$0xff] }
 0x163   :  { %988 = vmatprep.subr.mxu1 %v897_v33  ;;  %v2913_v33 = vld [vmem:[%s3091_s3 + $0x138] sm:$0xff] }
 0x164   :  { %989 = vmatpush1.msra.mxu1 %v896_v35  ;;  %v2922_v35 = vld [vmem:[%s3091_s3 + $0x1b0] sm:$0xff] }
 0x165   :  { %990 = vmatprep.subr.mxu1 %v893_v37  ;;  %v2931_v37 = vld [vmem:[%s3091_s3 + $0x130] sm:$0xff] }
 0x166   :  { %991 = vmatpush1.msra.mxu1 %v892_v39  ;;  %v2940_v39 = vld [vmem:[%s3091_s3 + $0x1a8] sm:$0xff] }
 0x167   :  { %992 = vmatprep.subr.mxu1 %v889_v41  ;;  %v2949_v41 = vld [vmem:[%s3091_s3 + $0x128] sm:$0xff] }
 0x168   :  { %993 = vmatpush1.msra.mxu1 %v888_v43  ;;  %v2958_v43 = vld [vmem:[%s3091_s3 + $0x1a0] sm:$0xff] }
 0x20d   :  { %v2020_v58 = vpop.f32.mrf.mxu1 }
 0x20e   :  { %v2582_v59 = vsub.f32 %v704_v45, %v2020_v58  ;;  %v885_v45 = vld [vmem:[%s3090_s2 + $0x28] sm:$0xff] }
 0x20f   :  { %v788_v60 = vpop.f32.mrf.mxu1  ;;  %994 = vmatprep.subr.mxu1 %v885_v45  ;;  %v2967_v45 = vld [vmem:[%s3091_s3 + $0x120] sm:$0xff] }
 0x210   :  { %v2584_v61 = vsub.f32 %v703_v44, %v788_v60  ;;  %v800_v63 = vmul.f32 %v2582_v59, %v2582_v59  ;;  %v890_v44 = vld [vmem:[%s3090_s2 + $0x50] sm:$0xff]  ;;  %995 = vmatpush1.msra.mxu1 %v884_v47  ;;  %v2976_v47 = vld [vmem:[%s3091_s3 + $0x198] sm:$0xff] }
 0x211   :  { %996 = vmatprep.subr.mxu1 %v881_v49  ;;  %v2985_v49 = vld [vmem:[%s3091_s3 + $0x118] sm:$0xff] }
 0x212   :  { %v799_v62 = vmul.f32 %v2584_v61, %v2584_v61  ;;  %997 = vmatpush1.msra.mxu1 %v880_v51  ;;  %v2994_v51 = vld [vmem:[%s3091_s3 + $0x190] sm:$0xff] }
 0x213   :  { %1665 = vmatprep.subr.mxu1 %v1191_v53  ;;  %v3003_v53 = vld [vmem:[%s3091_s3 + $0x110] sm:$0xff] }
 0x214   :  { %2053 = vmatprep.mubr.f32.mxu0 %v799_v62 }
 0x215   :  { %2054 = vmatmul.mubr.f32.vlgmr.msra.gmra.mxu0 %v800_v63 }
 0x216   :  { %1044 = vmatpush1.msra.mxu0 %v942_v0  ;;  %1107 = vmatprep.mubr.f32.mxu0 %v2111_v3  ;;  %v1175_v0 = vld [vmem:[%s3091_s3 + $0x78] sm:$0xff] }
 0x217   :  { %1045 = vmatprep.subr.mxu0 %v939_v1  ;;  %v2763_v1 = vld [vmem:[%s3091_s3 + $0x178] sm:$0xff] }
 0x218   :  { %1046 = vmatpush1.msra.mxu0 %v938_v2  ;;  %v1190_v2 = vld [vmem:[%s3091_s3 + $0xf0] sm:$0xff] }
 0x219   :  { %1047 = vmatprep.subr.mxu0 %v935_v4 }
 0x21a   :  { %1048 = vmatpush1.msra.mxu0 %v934_v5  ;;  %v1174_v5 = vld [vmem:[%s3091_s3 + $0x70] sm:$0xff] }
 0x21b   :  { %1049 = vmatprep.subr.mxu0 %v931_v6  ;;  %v2783_v6 = vld [vmem:[%s3091_s3 + $0x170] sm:$0xff] }
 0x21c   :  { %1050 = vmatpush1.msra.mxu0 %v930_v7  ;;  %v1173_v7 = vld [vmem:[%s3091_s3 + $0x68] sm:$0xff] }
 0x21d   :  { %1051 = vmatprep.subr.mxu0 %v927_v8  ;;  %v2800_v8 = vld [vmem:[%s3091_s3 + $0x168] sm:$0xff] }
 0x21e   :  { %1052 = vmatpush1.msra.mxu0 %v926_v9  ;;  %v1188_v9 = vld [vmem:[%s3091_s3 + $0xe0] sm:$0xff] }
 0x21f   :  { %1053 = vmatprep.subr.mxu0 %v923_v10  ;;  %v1172_v10 = vld [vmem:[%s3091_s3 + $0x60] sm:$0xff] }
 0x220   :  { %1054 = vmatpush1.msra.mxu0 %v922_v12  ;;  %v1187_v12 = vld [vmem:[%s3091_s3 + $0xd8] sm:$0xff] }
 0x221   :  { %1055 = vmatprep.subr.mxu0 %v919_v14  ;;  %v1171_v14 = vld [vmem:[%s3091_s3 + $0x58] sm:$0xff] }
 0x222   :  { %1056 = vmatpush1.msra.mxu0 %v918_v15  ;;  %v1186_v15 = vld [vmem:[%s3091_s3 + $0xd0] sm:$0xff] }
 0x223   :  { %1057 = vmatprep.subr.mxu0 %v915_v18  ;;  %v1170_v18 = vld [vmem:[%s3091_s3 + $0x50] sm:$0xff] }
 0x224   :  { %1058 = vmatpush1.msra.mxu0 %v914_v20  ;;  %v1185_v20 = vld [vmem:[%s3091_s3 + $0xc8] sm:$0xff] }
 0x225   :  { %1059 = vmatprep.subr.mxu0 %v911_v22  ;;  %v1169_v22 = vld [vmem:[%s3091_s3 + $0x48] sm:$0xff] }
 0x226   :  { %1060 = vmatpush1.msra.mxu0 %v910_v24  ;;  %v1184_v24 = vld [vmem:[%s3091_s3 + $0xc0] sm:$0xff] }
 0x227   :  { %1061 = vmatprep.subr.mxu0 %v907_v26  ;;  %v1168_v26 = vld [vmem:[%s3091_s3 + $0x40] sm:$0xff] }
 0x228   :  { %1062 = vmatpush1.msra.mxu0 %v906_v28  ;;  %v1183_v28 = vld [vmem:[%s3091_s3 + $0xb8] sm:$0xff] }
 0x229   :  { %1063 = vmatprep.subr.mxu0 %v903_v30  ;;  %v1167_v30 = vld [vmem:[%s3091_s3 + $0x38] sm:$0xff] }
 0x22a   :  { %1064 = vmatpush1.msra.mxu0 %v902_v32  ;;  %v1182_v32 = vld [vmem:[%s3091_s3 + $0xb0] sm:$0xff] }
 0x22b   :  { %1065 = vmatprep.subr.mxu0 %v899_v34  ;;  %v1166_v34 = vld [vmem:[%s3091_s3 + $0x30] sm:$0xff] }
 0x22c   :  { %1066 = vmatpush1.msra.mxu0 %v898_v36  ;;  %v1181_v36 = vld [vmem:[%s3091_s3 + $0xa8] sm:$0xff] }
 0x22d   :  { %1067 = vmatprep.subr.mxu0 %v895_v38  ;;  %v1165_v38 = vld [vmem:[%s3091_s3 + $0x28] sm:$0xff] }
 0x22e   :  { %1068 = vmatpush1.msra.mxu0 %v894_v40  ;;  %v1180_v40 = vld [vmem:[%s3091_s3 + $0xa0] sm:$0xff] }
 0x22f   :  { %1069 = vmatprep.subr.mxu0 %v891_v42  ;;  %v1164_v42 = vld [vmem:[%s3091_s3 + $0x20] sm:$0xff] }
 0x230   :  { %1070 = vmatpush1.msra.mxu0 %v890_v44  ;;  %v1179_v44 = vld [vmem:[%s3091_s3 + $0x98] sm:$0xff] }
 0x231   :  { %1071 = vmatprep.subr.mxu0 %v887_v46  ;;  %v1163_v46 = vld [vmem:[%s3091_s3 + $0x18] sm:$0xff] }
 0x232   :  { %1072 = vmatpush1.msra.mxu0 %v886_v48  ;;  %v1178_v48 = vld [vmem:[%s3091_s3 + $0x90] sm:$0xff] }
 0x233   :  { %1073 = vmatprep.subr.mxu0 %v883_v50  ;;  %v1162_v50 = vld [vmem:[%s3091_s3 + $0x10] sm:$0xff] }
 0x234   :  { %1074 = vmatpush1.msra.mxu0 %v882_v52  ;;  %v1177_v52 = vld [vmem:[%s3091_s3 + $0x88] sm:$0xff] }
 0x235   :  { %1703 = vmatprep.subr.mxu0 %v2753_v54 }
 0x2d5   :  { %v2055_v55 = vpop.f32.mrf.mxu0 }
 0x2d6   :  { %v873_v57 = vadd.f32 1e-06, %v2055_v55  ;;  %v1161_v55 = vld [vmem:[%s3091_s3 + $0x8] sm:$0xff] }
 0x2d7   :  { %v867_v56 = vpop.f32.mrf.mxu0 }
 0x2d8   :  { %v868_v58 = vadd.f32 1e-06, %v867_v56  ;;  %v3012_v56 = vld [vmem:[%s3091_s3 + $0x188] sm:$0xff] }
 0x2da   :  { %2089 = vrsqrt.f32 %v868_v58  ;;  %v3021_v58 = vld [vmem:[%s3091_s3 + $0x108] sm:$0xff] }
 0x2db   :  { %2091 = vrsqrt.f32 %v873_v57  ;;  %v1176_v57 = vld [vmem:[%s3091_s3 + $0x80] sm:$0xff] }
 0x2e7   :  { %v2090_v60 = vpop.eup %2089 }
 0x2e8   :  { %v878_v62 = vmul.f32 %v2090_v60, %v2584_v61  ;;  %v2092_v63 = vpop.eup %2091  ;;  %v2771_v61 = vld [vmem:[%s3091_s3 + $0x1f0] sm:$0xff]  ;;  %v1160_v60 = vld [vmem:[%s3091_s3] sm:$0xff] }
 0x2e9   :  { %v879_v4 = vmul.f32 %v2092_v63, %v2582_v59  ;;  %v2792_v59 = vld [vmem:[%s3091_s3 + $0x1e8] sm:$0xff]  ;;  %v3036_v63 = vld [vmem:[%s3091_s3 + $0x100] sm:$0xff] }
 0x2ea   :  { %1031 = vmatmul.mubr.f32.vlgmr.msra.gmra.mxu1 %v878_v62  ;;  %1108 = vmatmul.mubr.f32.vlgmr.msra.gmra.mxu0 %v878_v62  ;;  %v3030_v62 = vld [vmem:[%s3091_s3 + $0x180] sm:$0xff] }
 0x2eb   :  { %1036 = vmatprep.mubr.f32.mxu1 %v2111_v3  ;;  %1113 = vmatprep.mubr.f32.mxu0 %v2111_v3  ;;  %v1189_v3 = vld [vmem:[%s3091_s3 + $0xe8] sm:$0xff] }
 0x2ec   :  { %1666 = vmatpush3.msra.mxu1 %v1175_v0  ;;  %1704 = vmatpush3.msra.mxu0 %v2763_v1  ;;  %v946_v0 = vlaneseq }
 0x2ed   :  { %1667 = vmatprep.subr.mxu1 %v1190_v2  ;;  %1705 = vmatprep.subr.mxu0 %v2771_v61 }
 0x2ee   :  { %1037 = vmatmul.mubr.f32.gmra.mxu1 %v879_v4  ;;  %1114 = vmatmul.mubr.f32.gmra.mxu0 %v879_v4  ;;  %v947_v2 = vshrl.u32 %v946_v0, 7 }
 0x2ef   :  { %1668 = vmatpush3.msra.mxu1 %v1174_v5  ;;  %1706 = vmatpush3.msra.mxu0 %v2783_v6 }
 0x2f0   :  { %1669 = vmatprep.subr.mxu1 %v1189_v3  ;;  %1707 = vmatprep.subr.mxu0 %v2792_v59  ;;  %v948_v4 = vsub.s32 0, %v947_v2  ;;  %v956_v5 = vsub.s32 2, %v947_v2  ;;  %v944_v3 = vld [vmem:[%s3089_s4 + $0x1] sm:$0xf] }
 0x2f1   :  { %1670 = vmatpush3.msra.mxu1 %v1173_v7  ;;  %1708 = vmatpush3.msra.mxu0 %v2800_v8  ;;  %v952_v7 = vsub.s32 1, %v947_v2 }
 0x2f2   :  { %1671 = vmatprep.subr.mxu1 %v1188_v9  ;;  %1709 = vmatprep.subr.mxu0 %v2814_v11  ;;  %v960_v9 = vsub.s32 3, %v947_v2 }
 0x2f3   :  { %1672 = vmatpush3.msra.mxu1 %v1172_v10  ;;  %1710 = vmatpush3.msra.mxu0 %v2823_v13  ;;  %v949_v10 = vrot.slane %v944_v3, %v948_v4 }
 0x2f4   :  { %1673 = vmatprep.subr.mxu1 %v1187_v12  ;;  %1711 = vmatprep.subr.mxu0 %v2832_v17  ;;  %v3043_v12 = vrot.slane %v944_v3, %v956_v5 }
 0x2f5   :  { %1674 = vmatpush3.msra.mxu1 %v1171_v14  ;;  %1712 = vmatpush3.msra.mxu0 %v2841_v16 }
 0x2f6   :  { %1675 = vmatprep.subr.mxu1 %v1186_v15  ;;  %1713 = vmatprep.subr.mxu0 %v2850_v19 }
 0x2f7   :  { %1676 = vmatpush3.msra.mxu1 %v1170_v18  ;;  %1714 = vmatpush3.msra.mxu0 %v2859_v21  ;;  %v953_v18 = vrot.slane %v944_v3, %v952_v7 }
 0x2f8   :  { %1677 = vmatprep.subr.mxu1 %v1185_v20  ;;  %1715 = vmatprep.subr.mxu0 %v2868_v23  ;;  %v961_v20 = vrot.slane %v944_v3, %v960_v9 }
 0x2f9   :  { %1678 = vmatpush3.msra.mxu1 %v1169_v22  ;;  %1716 = vmatpush3.msra.mxu0 %v2877_v25 }
 0x2fa   :  { %1679 = vmatprep.subr.mxu1 %v1184_v24  ;;  %1717 = vmatprep.subr.mxu0 %v2886_v27 }
 0x2fb   :  { %1680 = vmatpush3.msra.mxu1 %v1168_v26  ;;  %1718 = vmatpush3.msra.mxu0 %v2895_v29 }
 0x2fc   :  { %1681 = vmatprep.subr.mxu1 %v1183_v28  ;;  %1719 = vmatprep.subr.mxu0 %v2904_v31 }
 0x2fd   :  { %1682 = vmatpush3.msra.mxu1 %v1167_v30  ;;  %1720 = vmatpush3.msra.mxu0 %v2913_v33 }
 0x2fe   :  { %1683 = vmatprep.subr.mxu1 %v1182_v32  ;;  %1721 = vmatprep.subr.mxu0 %v2922_v35 }
 0x2ff   :  { %1684 = vmatpush3.msra.mxu1 %v1166_v34  ;;  %1722 = vmatpush3.msra.mxu0 %v2931_v37 }
 0x300   :  { %1685 = vmatprep.subr.mxu1 %v1181_v36  ;;  %1723 = vmatprep.subr.mxu0 %v2940_v39 }
 0x301   :  { %1686 = vmatpush3.msra.mxu1 %v1165_v38  ;;  %1724 = vmatpush3.msra.mxu0 %v2949_v41 }
 0x302   :  { %1687 = vmatprep.subr.mxu1 %v1180_v40  ;;  %1725 = vmatprep.subr.mxu0 %v2958_v43 }
 0x303   :  { %1688 = vmatpush3.msra.mxu1 %v1164_v42  ;;  %1726 = vmatpush3.msra.mxu0 %v2967_v45 }
 0x304   :  { %1689 = vmatprep.subr.mxu1 %v1179_v44  ;;  %1727 = vmatprep.subr.mxu0 %v2976_v47 }
 0x305   :  { %1690 = vmatpush3.msra.mxu1 %v1163_v46  ;;  %1728 = vmatpush3.msra.mxu0 %v2985_v49 }
 0x306   :  { %1691 = vmatprep.subr.mxu1 %v1178_v48  ;;  %1729 = vmatprep.subr.mxu0 %v2994_v51 }
 0x307   :  { %1692 = vmatpush3.msra.mxu1 %v1162_v50  ;;  %1730 = vmatpush3.msra.mxu0 %v3003_v53 }
 0x308   :  { %1693 = vmatprep.subr.mxu1 %v1177_v52  ;;  %1731 = vmatprep.subr.mxu0 %v3012_v56 }
 0x309   :  { %1694 = vmatpush3.msra.mxu1 %v1161_v55  ;;  %1732 = vmatpush3.msra.mxu0 %v3021_v58 }
 0x30a   :  { %1695 = vmatprep.subr.mxu1 %v1176_v57  ;;  %1733 = vmatprep.subr.mxu0 %v3030_v62 }
 0x30b   :  { %1696 = vmatpush3.msra.mxu1 %v1160_v60  ;;  %1734 = vmatpush3.msra.mxu0 %v3036_v63 }
 0x30c   :  { %2056 = vmatprep.subr.mxu1 %v2753_v54 }
 0x3aa   :  { %v1032_v14 = vpop.f32.mrf.mxu1  ;;  %v1109_v15 = vpop.f32.mrf.mxu0 }
 0x3ab   :  { %v1033_v54 = vadd.f32 %v1032_v14, %v949_v10  ;;  %v1110_v22 = vadd.f32 %v1109_v15, %v3043_v12 }
 0x3ac   :  { %v1034_v24 = vpop.f32.mrf.mxu1  ;;  %v1111_v26 = vpop.f32.mrf.mxu0 }
 0x3ad   :  { %v1128_v28 = vmul.f32 0.70710677, %v1033_v54  ;;  %v1130_v30 = vmul.f32 0.70710677, %v1110_v22  ;;  %v1035_v32 = vadd.f32 %v1034_v24, %v953_v18  ;;  %v1112_v34 = vadd.f32 %v1111_v26, %v961_v20 }
 0x3ae   :  { %v1038_v36 = vpop.f32.mrf.mxu1  ;;  %v1115_v38 = vpop.f32.mrf.mxu0  ;;  %v1120_v15 = vmul.f32 0.5, %v1033_v54 }
 0x3af   :  { %2093 = verf.f32 %v1128_v28  ;;  %v1039_v40 = vadd.f32 %v1038_v36, %v949_v10  ;;  %v1129_v42 = vmul.f32 0.70710677, %v1035_v32  ;;  %v1131_v48 = vmul.f32 0.70710677, %v1112_v34 }
 0x3b0   :  { %2095 = verf.f32 %v1130_v30  ;;  %v1040_v44 = vpop.f32.mrf.mxu1  ;;  %v1117_v46 = vpop.f32.mrf.mxu0  ;;  %v1121_v9 = vmul.f32 0.5, %v1035_v32  ;;  %v1123_v24 = vmul.f32 0.5, %v1112_v34 }
 0x3b1   :  { %v1132_v50 = vmul.f32 0.70710677, %v1039_v40  ;;  %2097 = verf.f32 %v1129_v42  ;;  %v1041_v52 = vadd.f32 %v1040_v44, %v953_v18  ;;  %v1118_v55 = vadd.f32 %v1117_v46, %v961_v20 }
 0x3b2   :  { %2099 = verf.f32 %v1131_v48  ;;  %v1122_v18 = vmul.f32 0.5, %v1110_v22  ;;  %v1116_v22 = vadd.f32 %v1115_v38, %v3043_v12 }
 0x3b3   :  { %2101 = verf.f32 %v1132_v50  ;;  %v1133_v57 = vmul.f32 0.70710677, %v1041_v52  ;;  %v1135_v60 = vmul.f32 0.70710677, %v1118_v55  ;;  %v1125_v48 = vmul.f32 0.5, %v1041_v52 }
 0x3b5   :  { %2103 = verf.f32 %v1133_v57  ;;  %v1124_v57 = vmul.f32 0.5, %v1039_v40  ;;  %v1134_v40 = vmul.f32 0.70710677, %v1116_v22 }
 0x3b6   :  { %2105 = verf.f32 %v1135_v60  ;;  %v1127_v60 = vmul.f32 0.5, %v1118_v55 }
 0x3b7   :  { %2107 = verf.f32 %v1134_v40 }
 0x3bc   :  { %v2094_v0 = vpop.eup %2093 }
 0x3bd   :  { %v2096_v2 = vpop.eup %2095  ;;  %v1144_v5 = vadd.f32 1.0, %v2094_v0 }
 0x3be   :  { %v2098_v4 = vpop.eup %2097  ;;  %v1146_v7 = vadd.f32 1.0, %v2096_v2 }
 0x3bf   :  { %v2100_v3 = vpop.eup %2099  ;;  %v1145_v10 = vadd.f32 1.0, %v2098_v4  ;;  %v1152_v30 = vmul.f32 %v1144_v5, %v1120_v15 }
 0x3c0   :  { %v2102_v14 = vpop.eup %2101  ;;  %v1147_v26 = vadd.f32 1.0, %v2100_v3  ;;  %v1154_v46 = vmul.f32 %v1146_v7, %v1122_v18 }
 0x3c1   :  { %v1153_v20 = vmul.f32 %v1145_v10, %v1121_v9  ;;  %v1148_v42 = vadd.f32 1.0, %v2102_v14 }
 0x3c2   :  { %v2104_v28 = vpop.eup %2103  ;;  %v1155_v36 = vmul.f32 %v1147_v26, %v1123_v24 }
 0x3c3   :  { %v2106_v44 = vpop.eup %2105  ;;  %1295 = vmatprep.mubr.f32.mxu1 %v1153_v20  ;;  %v1149_v50 = vadd.f32 1.0, %v2104_v28  ;;  %v1156_v34 = vmul.f32 %v1148_v42, %v1124_v57 }
 0x3c4   :  { %1370 = vmatprep.mubr.f32.mxu0 %v1155_v36  ;;  %1296 = vmatmul.mubr.f32.vlgmr.msra.gmra.mxu1 %v1152_v30  ;;  %v1151_v32 = vadd.f32 1.0, %v2106_v44 }
 0x3c5   :  { %2072 = vmatpush3.msra.mxu1 %v2763_v1  ;;  %1371 = vmatmul.mubr.f32.vlgmr.msra.gmra.mxu0 %v1154_v46  ;;  %v1157_v54 = vmul.f32 %v1149_v50, %v1125_v48  ;;  %v2108_v1 = vpop.eup %2107 }
 0x3c6   :  { %2057 = vmatprep.subr.mxu1 %v2771_v61  ;;  %v1159_v52 = vmul.f32 %v1151_v32, %v1127_v60  ;;  %v1150_v61 = vadd.f32 1.0, %v2108_v1 }
 0x3c7   :  { %2073 = vmatpush3.msra.mxu1 %v2783_v6  ;;  %1300 = vmatprep.mubr.f32.mxu1 %v1157_v54  ;;  %v1126_v6 = vmul.f32 0.5, %v1116_v22 }
 0x3c8   :  { %2058 = vmatprep.subr.mxu1 %v2792_v59  ;;  %1301 = vmatmul.mubr.f32.gmra.mxu1 %v1156_v34 }
 0x3c9   :  { %2074 = vmatpush3.msra.mxu1 %v2800_v8  ;;  %1375 = vmatprep.mubr.f32.mxu1 %v1159_v52  ;;  %v1158_v59 = vmul.f32 %v1150_v61, %v1126_v6 }
 0x3ca   :  { %2059 = vmatprep.subr.mxu1 %v2814_v11 }
 0x3cb   :  { %2075 = vmatpush3.msra.mxu1 %v2823_v13  ;;  %v1502_v13 = vld [vmem:[%s3089_s4 + $0x5] ss:$0 sm:$0xff] }
 0x3cc   :  { %2060 = vmatprep.subr.mxu1 %v2832_v17 }
 0x3cd   :  { %2076 = vmatpush3.msra.mxu1 %v2841_v16 }
 0x3ce   :  { %2061 = vmatprep.subr.mxu1 %v2850_v19 }
 0x3cf   :  { %2077 = vmatpush3.msra.mxu1 %v2859_v21 }
 0x3d0   :  { %2062 = vmatprep.subr.mxu1 %v2868_v23 }
 0x3d1   :  { %2078 = vmatpush3.msra.mxu1 %v2877_v25 }
 0x3d2   :  { %2063 = vmatprep.subr.mxu1 %v2886_v27  ;;  %v2109_v27 = vld [vmem:[#allocation2 + $0x3] sm:$0xff] }
 0x3d3   :  { %2079 = vmatpush3.msra.mxu1 %v2895_v29 }
 0x3d4   :  { %2064 = vmatprep.subr.mxu1 %v2904_v31 }
 0x3d5   :  { %2080 = vmatpush3.msra.mxu1 %v2913_v33 }
 0x3d6   :  { %2065 = vmatprep.subr.mxu1 %v2922_v35 }
 0x3d7   :  { %2081 = vmatpush3.msra.mxu1 %v2931_v37 }
 0x3d8   :  { %2066 = vmatprep.subr.mxu1 %v2940_v39 }
 0x3d9   :  { %2082 = vmatpush3.msra.mxu1 %v2949_v41 }
 0x3da   :  { %2067 = vmatprep.subr.mxu1 %v2958_v43 }
 0x3db   :  { %2083 = vmatpush3.msra.mxu1 %v2967_v45 }
 0x3dc   :  { %2068 = vmatprep.subr.mxu1 %v2976_v47  ;;  %v2110_v47 = vld [vmem:[#allocation2 + $0xb] sm:$0xff] }
 0x3dd   :  { %2084 = vmatpush3.msra.mxu1 %v2985_v49 }
 0x3de   :  { %2069 = vmatprep.subr.mxu1 %v2994_v51 }
 0x3df   :  { %2085 = vmatpush3.msra.mxu1 %v3003_v53 }
 0x3e0   :  { %2070 = vmatprep.subr.mxu1 %v3012_v56 }
 0x3e1   :  { %2086 = vmatpush3.msra.mxu1 %v3021_v58 }
 0x3e2   :  { %2071 = vmatprep.subr.mxu1 %v3030_v62 }
 0x3e3   :  { %2087 = vmatpush3.msra.mxu1 %v3036_v63 }
 0x3e4   :  { %1376 = vmatmul.mubr.f32.vlgmr.msra.gmra.mxu1 %v1158_v59 }
 0x484   :  { %v1697_v8 = vpop.f32.mrf.mxu1 }
 0x485   :  { %v1735_v11 = vpop.f32.mrf.mxu0 }
 0x486   :  { %v1698_v17 = vpop.f32.mrf.mxu1 }
 0x487   :  { %v1699_v16 = vadd.f32 %v1698_v17, %v1697_v8  ;;  %v1736_v19 = vpop.f32.mrf.mxu0 }
 0x488   :  { %v1737_v23 = vadd.f32 %v1736_v19, %v1735_v11  ;;  %v1700_v31 = vpop.f32.mrf.mxu1 }
 0x489   :  { %v1298_v21 = vadd.f32 %v1699_v16, %v1502_v13 }
 0x48a   :  { %v1701_v33 = vpop.f32.mrf.mxu1 }
 0x48b   :  { %v1373_v25 = vadd.f32 %v1737_v23, %v1298_v21  ;;  %v1702_v35 = vadd.f32 %v1701_v33, %v1700_v31 }
 0x48d   :  { %v1381_v29 = vadd.f32 %v2109_v27, %v1373_v25  ;;  %v1303_v41 = vadd.f32 %v1702_v35, %v1502_v13 }
 0x48f   :  { %1383 = vst [vmem:[%s3092_s5] sm:$0xff] %v1381_v29 }
 0x4a4   :  { %v1738_v37 = vpop.f32.mrf.mxu1 }
 0x4a6   :  { %v1739_v39 = vpop.f32.mrf.mxu1 }
 0x4a7   :  { %v1740_v43 = vadd.f32 %v1739_v39, %v1738_v37 }
 0x4a9   :  { %v1378_v45 = vadd.f32 %v1740_v43, %v1303_v41 }
 0x4ab   :  { %v1382_v49 = vadd.f32 %v2110_v47, %v1378_v45 }
 0x4ad   :  { %1384 = vst [vmem:[%s3092_s5 + $0x8] sm:$0xff] %v1382_v49 }

</bundles_post_ra>
